<compile_context>
chip_gen: v7x
topology: tpu7x:2x2x1
jax: 0.10.0
libtpu: 0.0.40
codegen_flags: <defaults>
</compile_context>

<pallas_src>
import functools
import math

import jax
import jax.numpy as jnp
import numpy as np
from jax import lax
from jax.experimental import pallas as pl
from jax.experimental.pallas import tpu as pltpu


# ------------------------------ Pallas kernel -------------------------------

def _bihdm_fused_kernel(
        x2d_ref,                 # (L*N, 4*d_in)  rows ordered t*N + n
        wih_ref, whh_ref, bs_ref,        # (4*d_in, 4*ds), (4*ds, 4*ds), (1, 4*ds)
        wgih_ref, wghh_ref, bg_ref,      # (d_pair, 2*dg), (2*dg, 2*dg), (1, 2*dg)
        wphT_ref, bphT_ref,              # (K, L), (K, dg)
        wpvT_ref, bpvT_ref,              # (K, L), (K, dg)
        maphT_ref, mapvT_ref,            # (dg, d_out) each
        wcd_ref, bcd_ref,                # (d_out*K, nc+2)  [rows k-major], (1, nc+2)
        c_ref, d_ref,                    # outputs: (N, nc), (N, 2)
        ph_scr, g_hist, hv_scr,          # VMEM scratch
        *, L, N, ds, dg, d_out, K, nc, slope):
    f32 = jnp.float32

    # ---- Stage 1: 4 fused electrode-stream RNNs (block-diag, hidden = 4*ds = 128)
    # Hoisted input projection for every timestep at once.
    xw = jnp.dot(x2d_ref[...], wih_ref[...], preferred_element_type=f32) + bs_ref[...]
    whh = whh_ref[...]
    h = jnp.zeros((N, 4 * ds), dtype=f32)
    for t in range(L):                                   # fully unrolled, L = 8
        h = jnp.tanh(xw[t * N:(t + 1) * N, :] +
                     jnp.dot(h, whh, preferred_element_type=f32))
        # pairwise 'subtraction': lhs - rhs (both gh and gv consume this, as in
        # the reference module).  lv/rv live in h[:, 2*ds:] and are never read.
        ph_scr[t * N:(t + 1) * N, :] = h[:, :ds] - h[:, ds:2 * ds]

    # ---- Stage 2: the two fused 'global' RNNs (hidden = 2*dg = 64)
    xwg = jnp.dot(ph_scr[...], wgih_ref[...], preferred_element_type=f32) + bg_ref[...]
    wghh = wghh_ref[...]
    g = jnp.zeros((N, 2 * dg), dtype=f32)
    for t in range(L):
        g = jnp.tanh(xwg[t * N:(t + 1) * N, :] +
                     jnp.dot(g, wghh, preferred_element_type=f32))
        for n in range(N):                               # per-sample history rows
            g_hist[n * L + t:n * L + t + 1, :] = g[n:n + 1, :]

    # ---- Stage 3: head (LProjector + LeakyReLU + bias, then map_h / map_v),
    #      computed in a transposed (K, d) layout so no in-kernel transposes.
    wphT = wphT_ref[...]
    bphT = bphT_ref[...]
    wpvT = wpvT_ref[...]
    bpvT = bpvT_ref[...]
    maphT = maphT_ref[...]
    mapvT = mapvT_ref[...]
    for s in range(N):                                   # N = 2, unrolled
        g_s = g_hist[s * L:(s + 1) * L, :]               # (L, 2*dg)
        gh_s = g_s[:, :dg]                               # (L, dg)
        gv_s = g_s[:, dg:]
        # ws^T[k, d] = sum_t W[t, k] * g[t, d]
        wsT_h = jnp.dot(wphT, gh_s, preferred_element_type=f32)   # (K, dg)
        wsT_v = jnp.dot(wpvT, gv_s, preferred_element_type=f32)
        pT_h = jnp.where(wsT_h > 0, wsT_h, slope * wsT_h) + bphT
        pT_v = jnp.where(wsT_v > 0, wsT_v, slope * wsT_v) + bpvT
        hvT = (jnp.dot(pT_h, maphT, preferred_element_type=f32) +
               jnp.dot(pT_v, mapvT, preferred_element_type=f32))  # (K, d_out)
        # Flatten k-major into (1, K*d_out); classifier rows are pre-permuted to
        # match this order, so this is just K static row copies (no relayout op).
        for kk in range(K):
            hv_scr[s:s + 1, kk * d_out:(kk + 1) * d_out] = hvT[kk:kk + 1, :]

    # ---- Stage 4: fused class + domain linear heads and log-softmax.
    logits = (jnp.dot(hv_scr[...], wcd_ref[...], preferred_element_type=f32)
              + bcd_ref[...])                            # (N, nc + 2)
    lc = logits[:, :nc]
    ld = logits[:, nc:nc + 2]

    def log_softmax(z):
        m = jnp.max(z, axis=-1, keepdims=True)
        zs = z - m
        return zs - jnp.log(jnp.sum(jnp.exp(zs), axis=-1, keepdims=True))

    c_ref[...] = log_softmax(lc)
    d_ref[...] = log_softmax(ld)


# ------------------------------ host-side glue ------------------------------

def _block_diag(mats):
    rows = sum(m.shape[0] for m in mats)
    cols = sum(m.shape[1] for m in mats)
    out = jnp.zeros((rows, cols), jnp.float32)
    r = c = 0
    for m in mats:
        out = out.at[r:r + m.shape[0], c:c + m.shape[1]].set(m)
        r += m.shape[0]
        c += m.shape[1]
    return out


def _prepare_fused_params(p):
    """Pack per-RNN / per-head parameters into the fused-kernel layout."""
    wih_bd = _block_diag([p["rnn_lh"][0], p["rnn_rh"][0], p["rnn_lv"][0], p["rnn_rv"][0]])
    whh_bd = _block_diag([p["rnn_lh"][1], p["rnn_rh"][1], p["rnn_lv"][1], p["rnn_rv"][1]])
    b_s = jnp.concatenate([p["rnn_lh"][2], p["rnn_rh"][2], p["rnn_lv"][2], p["rnn_rv"][2]], axis=1)

    wgih = jnp.concatenate([p["rnn_hg"][0], p["rnn_vg"][0]], axis=1)
    wghh_bd = _block_diag([p["rnn_hg"][1], p["rnn_vg"][1]])
    b_g = jnp.concatenate([p["rnn_hg"][2], p["rnn_vg"][2]], axis=1)

    wphT, bphT = p["proj_h_w"].T, p["proj_h_b"].T
    wpvT, bpvT = p["proj_v_w"].T, p["proj_v_b"].T
    maphT, mapvT = p["map_h"].T, p["map_v"].T

    d_out, _ = p["map_h"].shape
    k = p["proj_h_w"].shape[1]
    nc = p["wc_t"].shape[1]
    wcd = jnp.concatenate([p["wc_t"], p["wd_t"]], axis=1)          # (d_out*k, nc+2)
    # permute rows from torch flatten order (o*k + kk) to the kernel's k-major
    # order (kk*d_out + o) so the in-kernel flatten is trivial.
    wcd_perm = wcd.reshape(d_out, k, nc + 2).transpose(1, 0, 2).reshape(k * d_out, nc + 2)
    b_cd = jnp.concatenate([p["bc"], p["bd"]], axis=1)

    return (wih_bd, whh_bd, b_s, wgih, wghh_bd, b_g,
            wphT, bphT, wpvT, bpvT, maphT, mapvT, wcd_perm, b_cd)


def bihdm_forward(x, params, streams, slope=0.01):
    lh, rh, lv, rv = streams
    N = x.shape[0]
    L = int(lh.shape[0])
    ds = params["rnn_lh"][0].shape[1]
    d_pair = params["rnn_hg"][0].shape[0]
    dg = params["rnn_hg"][0].shape[1]
    d_out = params["map_h"].shape[0]
    k = params["proj_h_w"].shape[1]
    nc = params["wc_t"].shape[1]

    def seq(idx):                                         # (N,C,d_in) -> (L,N,d_in)
        return jnp.transpose(x[:, idx, :], (1, 0, 2))

    x_cat = jnp.concatenate([seq(lh), seq(rh), seq(lv), seq(rv)], axis=-1)   # (L,N,4*d_in)
    x2d = x_cat.reshape(L * N, -1).astype(jnp.float32)                       # rows t*N + n

    fused = _prepare_fused_params(params)

    kernel = functools.partial(_bihdm_fused_kernel, L=L, N=N, ds=ds, dg=dg,
                               d_out=d_out, K=k, nc=nc, slope=slope)
    # Single fused call: no grid, whole (tiny) arrays live in VMEM.
    # TODO(synk): on v7x a >=2-wide parallel grid could use both TensorCores,
    # but the serial RNN recurrence dominates here so a single-TC fused kernel wins.
    return pl.pallas_call(
        kernel,
        out_shape=(jax.ShapeDtypeStruct((N, nc), jnp.float32),
                   jax.ShapeDtypeStruct((N, 2), jnp.float32)),
        scratch_shapes=[
            pltpu.VMEM((L * N, d_pair), jnp.float32),      # pairwise-sub sequence
            pltpu.VMEM((N * L, 2 * dg), jnp.float32),      # global RNN history
            pltpu.VMEM((N, d_out * k), jnp.float32),       # flattened hv
        ],
    )(x2d, *fused)


# --------------------------- pure-JAX reference -----------------------------

def bihdm_reference(x, p, streams, slope=0.01):
    def rnn_ref(seq, w_ih_t, w_hh_t, b):
        h0 = jnp.zeros((seq.shape[1], w_ih_t.shape[1]), jnp.float32)

        def step(h, x_t):
            h2 = jnp.tanh(x_t @ w_ih_t + h @ w_hh_t + b)
            return h2, h2

        _, ys = lax.scan(step, h0, seq)
        return ys

    lh, rh, lv, rv = streams
    seq = lambda idx: jnp.transpose(x[:, idx, :], (1, 0, 2))
    lhs = rnn_ref(seq(lh), *p["rnn_lh"])
    rhs = rnn_ref(seq(rh), *p["rnn_rh"])
    _ = rnn_ref(seq(lv), *p["rnn_lv"])
    _ = rnn_ref(seq(rv), *p["rnn_rv"])
    ph = lhs - rhs
    gh = jnp.transpose(rnn_ref(ph, *p["rnn_hg"]), (1, 0, 2))   # (N, L, dg)
    gv = jnp.transpose(rnn_ref(ph, *p["rnn_vg"]), (1, 0, 2))

    def proj(g, w, b):
        ws = jnp.einsum("nk,snd->sdk", w, g)
        return jnp.where(ws > 0, ws, slope * ws) + b

    gph = proj(gh, p["proj_h_w"], p["proj_h_b"])
    gpv = proj(gv, p["proj_v_w"], p["proj_v_b"])
    mh = jnp.einsum("og,sgk->sok", p["map_h"], gph)
    mv = jnp.einsum("og,sgk->sok", p["map_v"], gpv)
    hv = (mh + mv).reshape(x.shape[0], -1)
    c = jax.nn.log_softmax(hv @ p["wc_t"] + p["bc"], axis=-1)
    d = jax.nn.log_softmax(hv @ p["wd_t"] + p["bd"], axis=-1)
    return c, d


# ------------------------------- init / main --------------------------------

def init_params(key, L, d_input, d_stream, d_pair, d_global, d_out, k, n_classes):
    keys = list(jax.random.split(key, 24))

    def uni(kk, shape, bound):
        return jax.random.uniform(kk, shape, jnp.float32, -bound, bound)

    def rnn(k1, k2, k3, din, dh):
        # weights pre-transposed so the kernel does x @ W_ih^T as x @ w_ih_t
        w_ih_t = uni(k1, (din, dh), 1.0 / math.sqrt(din))
        w_hh_t = uni(k2, (dh, dh), 1.0 / math.sqrt(dh))
        b = uni(k3, (1, dh), 1.0 / math.sqrt(dh))      # b_ih + b_hh combined
        return (w_ih_t, w_hh_t, b)

    p = {}
    p["rnn_lh"] = rnn(keys[0], keys[1], keys[2], d_input, d_stream)
    p["rnn_rh"] = rnn(keys[3], keys[4], keys[5], d_input, d_stream)
    p["rnn_lv"] = rnn(keys[6], keys[7], keys[8], d_input, d_stream)
    p["rnn_rv"] = rnn(keys[9], keys[10], keys[11], d_input, d_stream)
    p["rnn_hg"] = rnn(keys[12], keys[13], keys[14], d_pair, d_global)
    p["rnn_vg"] = rnn(keys[15], keys[16], keys[17], d_pair, d_global)

    p["proj_h_w"] = uni(keys[18], (L, k), math.sqrt(3.0 / L))
    p["proj_h_b"] = uni(keys[19], (d_global, k), 1.0 / math.sqrt(L))
    p["proj_v_w"] = uni(keys[20], (L, k), math.sqrt(3.0 / L))
    p["proj_v_b"] = uni(keys[21], (d_global, k), 1.0 / math.sqrt(L))

    kmh, kmv, kwc, kbc, kwd, kbd = jax.random.split(keys[22], 6)
    p["map_h"] = uni(kmh, (d_out, d_global), math.sqrt(6.0 / (d_out + d_global)))
    p["map_v"] = uni(kmv, (d_out, d_global), math.sqrt(6.0 / (d_out + d_global)))
    F = d_out * k
    p["wc_t"] = uni(kwc, (F, n_classes), math.sqrt(6.0 / (F + n_classes)))
    p["bc"] = uni(kbc, (1, n_classes), 1.0 / math.sqrt(F))
    p["wd_t"] = uni(kwd, (F, 2), math.sqrt(6.0 / (F + 2)))
    p["bd"] = uni(kbd, (1, 2), 1.0 / math.sqrt(F))
    return p


if __name__ == "__main__":
    # Small, module-consistent shapes.
    N, C, d_input = 2, 16, 8          # batch, electrodes, raw features
    L = 8                             # electrodes per stream
    d_stream = d_pair = d_global = 32
    d_out, k, n_classes = 16, 6, 3
    slope = 0.01

    # Stream index lists (left / right hemisphere, horizontal / vertical orderings).
    lh_stream = list(range(0, 8))
    rh_stream = list(range(8, 16))
    lv_stream = [0, 2, 4, 6, 1, 3, 5, 7]
    rv_stream = [8, 10, 12, 14, 9, 11, 13, 15]
    streams = tuple(jnp.asarray(s, dtype=jnp.int32)
                    for s in (lh_stream, rh_stream, lv_stream, rv_stream))

    key = jax.random.PRNGKey(0)
    kx, kp = jax.random.split(key)
    x = jax.random.normal(kx, (N, C, d_input), dtype=jnp.float32)
    params = init_params(kp, L, d_input, d_stream, d_pair, d_global, d_out, k, n_classes)

    fwd = jax.jit(bihdm_forward)
    out_class, out_domain = fwd(x, params, streams)
    jax.block_until_ready(out_class)
    jax.block_until_ready(out_domain)

    ref_class, ref_domain = bihdm_reference(x, params, streams, slope)
    np.testing.assert_allclose(np.asarray(out_class), np.asarray(ref_class),
                               rtol=5e-3, atol=5e-3)
    np.testing.assert_allclose(np.asarray(out_domain), np.asarray(ref_domain),
                               rtol=5e-3, atol=5e-3)
    assert out_class.shape == (N, n_classes) and out_domain.shape == (N, 2)

    print("KERNEL_OK")
</pallas_src>

<mosaic_0001>
module attributes {stable_mosaic.version = 11 : i64} {
  func.func @_bihdm_fused_kernel(%arg0: memref<16x32xf32, #tpu.memory_space<vmem>>, %arg1: memref<32x128xf32, #tpu.memory_space<vmem>>, %arg2: memref<128x128xf32, #tpu.memory_space<vmem>>, %arg3: memref<1x128xf32, #tpu.memory_space<vmem>>, %arg4: memref<32x64xf32, #tpu.memory_space<vmem>>, %arg5: memref<64x64xf32, #tpu.memory_space<vmem>>, %arg6: memref<1x64xf32, #tpu.memory_space<vmem>>, %arg7: memref<6x8xf32, #tpu.memory_space<vmem>>, %arg8: memref<6x32xf32, #tpu.memory_space<vmem>>, %arg9: memref<6x8xf32, #tpu.memory_space<vmem>>, %arg10: memref<6x32xf32, #tpu.memory_space<vmem>>, %arg11: memref<32x16xf32, #tpu.memory_space<vmem>>, %arg12: memref<32x16xf32, #tpu.memory_space<vmem>>, %arg13: memref<96x5xf32, #tpu.memory_space<vmem>>, %arg14: memref<1x5xf32, #tpu.memory_space<vmem>>, %arg15: memref<2x3xf32, #tpu.memory_space<vmem>>, %arg16: memref<2x2xf32, #tpu.memory_space<vmem>>, %arg17: memref<16x32xf32, #tpu.memory_space<vmem>>, %arg18: memref<16x64xf32, #tpu.memory_space<vmem>>, %arg19: memref<2x96xf32, #tpu.memory_space<vmem>>) attributes {dimension_semantics = [], scalar_prefetch = 0 : i64, scratch_operands = 3 : i64, tpu.core_type = #tpu.core_type<tc>} {
    %c0 = arith.constant 0 : index
    %c0_0 = arith.constant 0 : index
    %0 = vector.load %arg0[%c0, %c0_0] : memref<16x32xf32, #tpu.memory_space<vmem>>, vector<16x32xf32>
    %c0_1 = arith.constant 0 : index
    %c0_2 = arith.constant 0 : index
    %1 = vector.load %arg1[%c0_1, %c0_2] : memref<32x128xf32, #tpu.memory_space<vmem>>, vector<32x128xf32>
    %cst = arith.constant dense<0.000000e+00> : vector<16x128xf32>
    %2 = tpu.matmul %0, %1, %cst {dimension_numbers = #tpu.dot_dimension_numbers<[1], [0], [0], [1], [0, 0, 1, 1], [], []>} : vector<16x32xf32>, vector<32x128xf32>, vector<16x128xf32> -> vector<16x128xf32>
    %c0_3 = arith.constant 0 : index
    %c0_4 = arith.constant 0 : index
    %3 = vector.load %arg3[%c0_3, %c0_4] : memref<1x128xf32, #tpu.memory_space<vmem>>, vector<1x128xf32>
    %4 = vector.broadcast %3 : vector<1x128xf32> to vector<16x128xf32>
    %5 = arith.addf %2, %4 : vector<16x128xf32>
    %c0_5 = arith.constant 0 : index
    %c0_6 = arith.constant 0 : index
    %6 = vector.load %arg2[%c0_5, %c0_6] : memref<128x128xf32, #tpu.memory_space<vmem>>, vector<128x128xf32>
    %cst_7 = arith.constant 0.000000e+00 : f32
    %7 = vector.broadcast %cst_7 : f32 to vector<2x128xf32>
    %8 = vector.extract_strided_slice %5 {offsets = [0, 0], sizes = [2, 128], strides = [1, 1]} : vector<16x128xf32> to vector<2x128xf32>
    %cst_8 = arith.constant dense<0.000000e+00> : vector<2x128xf32>
    %9 = tpu.matmul %7, %6, %cst_8 {dimension_numbers = #tpu.dot_dimension_numbers<[1], [0], [0], [1], [0, 0, 1, 1], [], []>} : vector<2x128xf32>, vector<128x128xf32>, vector<2x128xf32> -> vector<2x128xf32>
    %10 = arith.addf %8, %9 : vector<2x128xf32>
    %11 = math.tanh %10 : vector<2x128xf32>
    %12 = vector.extract_strided_slice %11 {offsets = [0, 0], sizes = [2, 32], strides = [1, 1]} : vector<2x128xf32> to vector<2x32xf32>
    %13 = vector.extract_strided_slice %11 {offsets = [0, 32], sizes = [2, 32], strides = [1, 1]} : vector<2x128xf32> to vector<2x32xf32>
    %14 = arith.subf %12, %13 : vector<2x32xf32>
    %c0_9 = arith.constant 0 : index
    %c0_10 = arith.constant 0 : index
    %15 = vector.load %arg17[%c0_9, %c0_10] : memref<16x32xf32, #tpu.memory_space<vmem>>, vector<2x32xf32>
    tpu.vector_store %arg17[%c0_9, %c0_10], %14 {strides = array<i32>} : memref<16x32xf32, #tpu.memory_space<vmem>>, vector<2x32xf32>,
    %16 = vector.extract_strided_slice %5 {offsets = [2, 0], sizes = [2, 128], strides = [1, 1]} : vector<16x128xf32> to vector<2x128xf32>
    %cst_11 = arith.constant dense<0.000000e+00> : vector<2x128xf32>
    %17 = tpu.matmul %11, %6, %cst_11 {dimension_numbers = #tpu.dot_dimension_numbers<[1], [0], [0], [1], [0, 0, 1, 1], [], []>} : vector<2x128xf32>, vector<128x128xf32>, vector<2x128xf32> -> vector<2x128xf32>
    %18 = arith.addf %16, %17 : vector<2x128xf32>
    %19 = math.tanh %18 : vector<2x128xf32>
    %20 = vector.extract_strided_slice %19 {offsets = [0, 0], sizes = [2, 32], strides = [1, 1]} : vector<2x128xf32> to vector<2x32xf32>
    %21 = vector.extract_strided_slice %19 {offsets = [0, 32], sizes = [2, 32], strides = [1, 1]} : vector<2x128xf32> to vector<2x32xf32>
    %22 = arith.subf %20, %21 : vector<2x32xf32>
    %c2 = arith.constant 2 : index
    %c0_12 = arith.constant 0 : index
    %23 = vector.load %arg17[%c2, %c0_12] : memref<16x32xf32, #tpu.memory_space<vmem>>, vector<2x32xf32>
    tpu.vector_store %arg17[%c2, %c0_12], %22 {strides = array<i32>} : memref<16x32xf32, #tpu.memory_space<vmem>>, vector<2x32xf32>,
    %24 = vector.extract_strided_slice %5 {offsets = [4, 0], sizes = [2, 128], strides = [1, 1]} : vector<16x128xf32> to vector<2x128xf32>
    %cst_13 = arith.constant dense<0.000000e+00> : vector<2x128xf32>
    %25 = tpu.matmul %19, %6, %cst_13 {dimension_numbers = #tpu.dot_dimension_numbers<[1], [0], [0], [1], [0, 0, 1, 1], [], []>} : vector<2x128xf32>, vector<128x128xf32>, vector<2x128xf32> -> vector<2x128xf32>
    %26 = arith.addf %24, %25 : vector<2x128xf32>
    %27 = math.tanh %26 : vector<2x128xf32>
    %28 = vector.extract_strided_slice %27 {offsets = [0, 0], sizes = [2, 32], strides = [1, 1]} : vector<2x128xf32> to vector<2x32xf32>
    %29 = vector.extract_strided_slice %27 {offsets = [0, 32], sizes = [2, 32], strides = [1, 1]} : vector<2x128xf32> to vector<2x32xf32>
    %30 = arith.subf %28, %29 : vector<2x32xf32>
    %c4 = arith.constant 4 : index
    %c0_14 = arith.constant 0 : index
    %31 = vector.load %arg17[%c4, %c0_14] : memref<16x32xf32, #tpu.memory_space<vmem>>, vector<2x32xf32>
    tpu.vector_store %arg17[%c4, %c0_14], %30 {strides = array<i32>} : memref<16x32xf32, #tpu.memory_space<vmem>>, vector<2x32xf32>,
    %32 = vector.extract_strided_slice %5 {offsets = [6, 0], sizes = [2, 128], strides = [1, 1]} : vector<16x128xf32> to vector<2x128xf32>
    %cst_15 = arith.constant dense<0.000000e+00> : vector<2x128xf32>
    %33 = tpu.matmul %27, %6, %cst_15 {dimension_numbers = #tpu.dot_dimension_numbers<[1], [0], [0], [1], [0, 0, 1, 1], [], []>} : vector<2x128xf32>, vector<128x128xf32>, vector<2x128xf32> -> vector<2x128xf32>
    %34 = arith.addf %32, %33 : vector<2x128xf32>
    %35 = math.tanh %34 : vector<2x128xf32>
    %36 = vector.extract_strided_slice %35 {offsets = [0, 0], sizes = [2, 32], strides = [1, 1]} : vector<2x128xf32> to vector<2x32xf32>
    %37 = vector.extract_strided_slice %35 {offsets = [0, 32], sizes = [2, 32], strides = [1, 1]} : vector<2x128xf32> to vector<2x32xf32>
    %38 = arith.subf %36, %37 : vector<2x32xf32>
    %c6 = arith.constant 6 : index
    %c0_16 = arith.constant 0 : index
    %39 = vector.load %arg17[%c6, %c0_16] : memref<16x32xf32, #tpu.memory_space<vmem>>, vector<2x32xf32>
    tpu.vector_store %arg17[%c6, %c0_16], %38 {strides = array<i32>} : memref<16x32xf32, #tpu.memory_space<vmem>>, vector<2x32xf32>,
    %40 = vector.extract_strided_slice %5 {offsets = [8, 0], sizes = [2, 128], strides = [1, 1]} : vector<16x128xf32> to vector<2x128xf32>
    %cst_17 = arith.constant dense<0.000000e+00> : vector<2x128xf32>
    %41 = tpu.matmul %35, %6, %cst_17 {dimension_numbers = #tpu.dot_dimension_numbers<[1], [0], [0], [1], [0, 0, 1, 1], [], []>} : vector<2x128xf32>, vector<128x128xf32>, vector<2x128xf32> -> vector<2x128xf32>
    %42 = arith.addf %40, %41 : vector<2x128xf32>
    %43 = math.tanh %42 : vector<2x128xf32>
    %44 = vector.extract_strided_slice %43 {offsets = [0, 0], sizes = [2, 32], strides = [1, 1]} : vector<2x128xf32> to vector<2x32xf32>
    %45 = vector.extract_strided_slice %43 {offsets = [0, 32], sizes = [2, 32], strides = [1, 1]} : vector<2x128xf32> to vector<2x32xf32>
    %46 = arith.subf %44, %45 : vector<2x32xf32>
    %c8 = arith.constant 8 : index
    %c0_18 = arith.constant 0 : index
    %47 = vector.load %arg17[%c8, %c0_18] : memref<16x32xf32, #tpu.memory_space<vmem>>, vector<2x32xf32>
    tpu.vector_store %arg17[%c8, %c0_18], %46 {strides = array<i32>} : memref<16x32xf32, #tpu.memory_space<vmem>>, vector<2x32xf32>,
    %48 = vector.extract_strided_slice %5 {offsets = [10, 0], sizes = [2, 128], strides = [1, 1]} : vector<16x128xf32> to vector<2x128xf32>
    %cst_19 = arith.constant dense<0.000000e+00> : vector<2x128xf32>
    %49 = tpu.matmul %43, %6, %cst_19 {dimension_numbers = #tpu.dot_dimension_numbers<[1], [0], [0], [1], [0, 0, 1, 1], [], []>} : vector<2x128xf32>, vector<128x128xf32>, vector<2x128xf32> -> vector<2x128xf32>
    %50 = arith.addf %48, %49 : vector<2x128xf32>
    %51 = math.tanh %50 : vector<2x128xf32>
    %52 = vector.extract_strided_slice %51 {offsets = [0, 0], sizes = [2, 32], strides = [1, 1]} : vector<2x128xf32> to vector<2x32xf32>
    %53 = vector.extract_strided_slice %51 {offsets = [0, 32], sizes = [2, 32], strides = [1, 1]} : vector<2x128xf32> to vector<2x32xf32>
    %54 = arith.subf %52, %53 : vector<2x32xf32>
    %c10 = arith.constant 10 : index
    %c0_20 = arith.constant 0 : index
    %55 = vector.load %arg17[%c10, %c0_20] : memref<16x32xf32, #tpu.memory_space<vmem>>, vector<2x32xf32>
    tpu.vector_store %arg17[%c10, %c0_20], %54 {strides = array<i32>} : memref<16x32xf32, #tpu.memory_space<vmem>>, vector<2x32xf32>,
    %56 = vector.extract_strided_slice %5 {offsets = [12, 0], sizes = [2, 128], strides = [1, 1]} : vector<16x128xf32> to vector<2x128xf32>
    %cst_21 = arith.constant dense<0.000000e+00> : vector<2x128xf32>
    %57 = tpu.matmul %51, %6, %cst_21 {dimension_numbers = #tpu.dot_dimension_numbers<[1], [0], [0], [1], [0, 0, 1, 1], [], []>} : vector<2x128xf32>, vector<128x128xf32>, vector<2x128xf32> -> vector<2x128xf32>
    %58 = arith.addf %56, %57 : vector<2x128xf32>
    %59 = math.tanh %58 : vector<2x128xf32>
    %60 = vector.extract_strided_slice %59 {offsets = [0, 0], sizes = [2, 32], strides = [1, 1]} : vector<2x128xf32> to vector<2x32xf32>
    %61 = vector.extract_strided_slice %59 {offsets = [0, 32], sizes = [2, 32], strides = [1, 1]} : vector<2x128xf32> to vector<2x32xf32>
    %62 = arith.subf %60, %61 : vector<2x32xf32>
    %c12 = arith.constant 12 : index
    %c0_22 = arith.constant 0 : index
    %63 = vector.load %arg17[%c12, %c0_22] : memref<16x32xf32, #tpu.memory_space<vmem>>, vector<2x32xf32>
    tpu.vector_store %arg17[%c12, %c0_22], %62 {strides = array<i32>} : memref<16x32xf32, #tpu.memory_space<vmem>>, vector<2x32xf32>,
    %64 = vector.extract_strided_slice %5 {offsets = [14, 0], sizes = [2, 128], strides = [1, 1]} : vector<16x128xf32> to vector<2x128xf32>
    %cst_23 = arith.constant dense<0.000000e+00> : vector<2x128xf32>
    %65 = tpu.matmul %59, %6, %cst_23 {dimension_numbers = #tpu.dot_dimension_numbers<[1], [0], [0], [1], [0, 0, 1, 1], [], []>} : vector<2x128xf32>, vector<128x128xf32>, vector<2x128xf32> -> vector<2x128xf32>
    %66 = arith.addf %64, %65 : vector<2x128xf32>
    %67 = math.tanh %66 : vector<2x128xf32>
    %68 = vector.extract_strided_slice %67 {offsets = [0, 0], sizes = [2, 32], strides = [1, 1]} : vector<2x128xf32> to vector<2x32xf32>
    %69 = vector.extract_strided_slice %67 {offsets = [0, 32], sizes = [2, 32], strides = [1, 1]} : vector<2x128xf32> to vector<2x32xf32>
    %70 = arith.subf %68, %69 : vector<2x32xf32>
    %c14 = arith.constant 14 : index
    %c0_24 = arith.constant 0 : index
    %71 = vector.load %arg17[%c14, %c0_24] : memref<16x32xf32, #tpu.memory_space<vmem>>, vector<2x32xf32>
    tpu.vector_store %arg17[%c14, %c0_24], %70 {strides = array<i32>} : memref<16x32xf32, #tpu.memory_space<vmem>>, vector<2x32xf32>,
    %c0_25 = arith.constant 0 : index
    %c0_26 = arith.constant 0 : index
    %72 = vector.load %arg17[%c0_25, %c0_26] : memref<16x32xf32, #tpu.memory_space<vmem>>, vector<16x32xf32>
    %c0_27 = arith.constant 0 : index
    %c0_28 = arith.constant 0 : index
    %73 = vector.load %arg4[%c0_27, %c0_28] : memref<32x64xf32, #tpu.memory_space<vmem>>, vector<32x64xf32>
    %cst_29 = arith.constant dense<0.000000e+00> : vector<16x64xf32>
    %74 = tpu.matmul %72, %73, %cst_29 {dimension_numbers = #tpu.dot_dimension_numbers<[1], [0], [0], [1], [0, 0, 1, 1], [], []>} : vector<16x32xf32>, vector<32x64xf32>, vector<16x64xf32> -> vector<16x64xf32>
    %c0_30 = arith.constant 0 : index
    %c0_31 = arith.constant 0 : index
    %75 = vector.load %arg6[%c0_30, %c0_31] : memref<1x64xf32, #tpu.memory_space<vmem>>, vector<1x64xf32>
    %76 = vector.broadcast %75 : vector<1x64xf32> to vector<16x64xf32>
    %77 = arith.addf %74, %76 : vector<16x64xf32>
    %c0_32 = arith.constant 0 : index
    %c0_33 = arith.constant 0 : index
    %78 = vector.load %arg5[%c0_32, %c0_33] : memref<64x64xf32, #tpu.memory_space<vmem>>, vector<64x64xf32>
    %cst_34 = arith.constant 0.000000e+00 : f32
    %79 = vector.broadcast %cst_34 : f32 to vector<2x64xf32>
    %80 = vector.extract_strided_slice %77 {offsets = [0, 0], sizes = [2, 64], strides = [1, 1]} : vector<16x64xf32> to vector<2x64xf32>
    %cst_35 = arith.constant dense<0.000000e+00> : vector<2x64xf32>
    %81 = tpu.matmul %79, %78, %cst_35 {dimension_numbers = #tpu.dot_dimension_numbers<[1], [0], [0], [1], [0, 0, 1, 1], [], []>} : vector<2x64xf32>, vector<64x64xf32>, vector<2x64xf32> -> vector<2x64xf32>
    %82 = arith.addf %80, %81 : vector<2x64xf32>
    %83 = math.tanh %82 : vector<2x64xf32>
    %84 = vector.extract_strided_slice %83 {offsets = [0, 0], sizes = [1, 64], strides = [1, 1]} : vector<2x64xf32> to vector<1x64xf32>
    %c0_36 = arith.constant 0 : index
    %c0_37 = arith.constant 0 : index
    %85 = vector.load %arg18[%c0_36, %c0_37] : memref<16x64xf32, #tpu.memory_space<vmem>>, vector<1x64xf32>
    tpu.vector_store %arg18[%c0_36, %c0_37], %84 {strides = array<i32>} : memref<16x64xf32, #tpu.memory_space<vmem>>, vector<1x64xf32>,
    %86 = vector.extract_strided_slice %83 {offsets = [1, 0], sizes = [1, 64], strides = [1, 1]} : vector<2x64xf32> to vector<1x64xf32>
    %c8_38 = arith.constant 8 : index
    %c0_39 = arith.constant 0 : index
    %87 = vector.load %arg18[%c8_38, %c0_39] : memref<16x64xf32, #tpu.memory_space<vmem>>, vector<1x64xf32>
    tpu.vector_store %arg18[%c8_38, %c0_39], %86 {strides = array<i32>} : memref<16x64xf32, #tpu.memory_space<vmem>>, vector<1x64xf32>,
    %88 = vector.extract_strided_slice %77 {offsets = [2, 0], sizes = [2, 64], strides = [1, 1]} : vector<16x64xf32> to vector<2x64xf32>
    %cst_40 = arith.constant dense<0.000000e+00> : vector<2x64xf32>
    %89 = tpu.matmul %83, %78, %cst_40 {dimension_numbers = #tpu.dot_dimension_numbers<[1], [0], [0], [1], [0, 0, 1, 1], [], []>} : vector<2x64xf32>, vector<64x64xf32>, vector<2x64xf32> -> vector<2x64xf32>
    %90 = arith.addf %88, %89 : vector<2x64xf32>
    %91 = math.tanh %90 : vector<2x64xf32>
    %92 = vector.extract_strided_slice %91 {offsets = [0, 0], sizes = [1, 64], strides = [1, 1]} : vector<2x64xf32> to vector<1x64xf32>
    %c1 = arith.constant 1 : index
    %c0_41 = arith.constant 0 : index
    %93 = vector.load %arg18[%c1, %c0_41] : memref<16x64xf32, #tpu.memory_space<vmem>>, vector<1x64xf32>
    tpu.vector_store %arg18[%c1, %c0_41], %92 {strides = array<i32>} : memref<16x64xf32, #tpu.memory_space<vmem>>, vector<1x64xf32>,
    %94 = vector.extract_strided_slice %91 {offsets = [1, 0], sizes = [1, 64], strides = [1, 1]} : vector<2x64xf32> to vector<1x64xf32>
    %c9 = arith.constant 9 : index
    %c0_42 = arith.constant 0 : index
    %95 = vector.load %arg18[%c9, %c0_42] : memref<16x64xf32, #tpu.memory_space<vmem>>, vector<1x64xf32>
    tpu.vector_store %arg18[%c9, %c0_42], %94 {strides = array<i32>} : memref<16x64xf32, #tpu.memory_space<vmem>>, vector<1x64xf32>,
    %96 = vector.extract_strided_slice %77 {offsets = [4, 0], sizes = [2, 64], strides = [1, 1]} : vector<16x64xf32> to vector<2x64xf32>
    %cst_43 = arith.constant dense<0.000000e+00> : vector<2x64xf32>
    %97 = tpu.matmul %91, %78, %cst_43 {dimension_numbers = #tpu.dot_dimension_numbers<[1], [0], [0], [1], [0, 0, 1, 1], [], []>} : vector<2x64xf32>, vector<64x64xf32>, vector<2x64xf32> -> vector<2x64xf32>
    %98 = arith.addf %96, %97 : vector<2x64xf32>
    %99 = math.tanh %98 : vector<2x64xf32>
    %100 = vector.extract_strided_slice %99 {offsets = [0, 0], sizes = [1, 64], strides = [1, 1]} : vector<2x64xf32> to vector<1x64xf32>
    %c2_44 = arith.constant 2 : index
    %c0_45 = arith.constant 0 : index
    %101 = vector.load %arg18[%c2_44, %c0_45] : memref<16x64xf32, #tpu.memory_space<vmem>>, vector<1x64xf32>
    tpu.vector_store %arg18[%c2_44, %c0_45], %100 {strides = array<i32>} : memref<16x64xf32, #tpu.memory_space<vmem>>, vector<1x64xf32>,
    %102 = vector.extract_strided_slice %99 {offsets = [1, 0], sizes = [1, 64], strides = [1, 1]} : vector<2x64xf32> to vector<1x64xf32>
    %c10_46 = arith.constant 10 : index
    %c0_47 = arith.constant 0 : index
    %103 = vector.load %arg18[%c10_46, %c0_47] : memref<16x64xf32, #tpu.memory_space<vmem>>, vector<1x64xf32>
    tpu.vector_store %arg18[%c10_46, %c0_47], %102 {strides = array<i32>} : memref<16x64xf32, #tpu.memory_space<vmem>>, vector<1x64xf32>,
    %104 = vector.extract_strided_slice %77 {offsets = [6, 0], sizes = [2, 64], strides = [1, 1]} : vector<16x64xf32> to vector<2x64xf32>
    %cst_48 = arith.constant dense<0.000000e+00> : vector<2x64xf32>
    %105 = tpu.matmul %99, %78, %cst_48 {dimension_numbers = #tpu.dot_dimension_numbers<[1], [0], [0], [1], [0, 0, 1, 1], [], []>} : vector<2x64xf32>, vector<64x64xf32>, vector<2x64xf32> -> vector<2x64xf32>
    %106 = arith.addf %104, %105 : vector<2x64xf32>
    %107 = math.tanh %106 : vector<2x64xf32>
    %108 = vector.extract_strided_slice %107 {offsets = [0, 0], sizes = [1, 64], strides = [1, 1]} : vector<2x64xf32> to vector<1x64xf32>
    %c3 = arith.constant 3 : index
    %c0_49 = arith.constant 0 : index
    %109 = vector.load %arg18[%c3, %c0_49] : memref<16x64xf32, #tpu.memory_space<vmem>>, vector<1x64xf32>
    tpu.vector_store %arg18[%c3, %c0_49], %108 {strides = array<i32>} : memref<16x64xf32, #tpu.memory_space<vmem>>, vector<1x64xf32>,
    %110 = vector.extract_strided_slice %107 {offsets = [1, 0], sizes = [1, 64], strides = [1, 1]} : vector<2x64xf32> to vector<1x64xf32>
    %c11 = arith.constant 11 : index
    %c0_50 = arith.constant 0 : index
    %111 = vector.load %arg18[%c11, %c0_50] : memref<16x64xf32, #tpu.memory_space<vmem>>, vector<1x64xf32>
    tpu.vector_store %arg18[%c11, %c0_50], %110 {strides = array<i32>} : memref<16x64xf32, #tpu.memory_space<vmem>>, vector<1x64xf32>,
    %112 = vector.extract_strided_slice %77 {offsets = [8, 0], sizes = [2, 64], strides = [1, 1]} : vector<16x64xf32> to vector<2x64xf32>
    %cst_51 = arith.constant dense<0.000000e+00> : vector<2x64xf32>
    %113 = tpu.matmul %107, %78, %cst_51 {dimension_numbers = #tpu.dot_dimension_numbers<[1], [0], [0], [1], [0, 0, 1, 1], [], []>} : vector<2x64xf32>, vector<64x64xf32>, vector<2x64xf32> -> vector<2x64xf32>
    %114 = arith.addf %112, %113 : vector<2x64xf32>
    %115 = math.tanh %114 : vector<2x64xf32>
    %116 = vector.extract_strided_slice %115 {offsets = [0, 0], sizes = [1, 64], strides = [1, 1]} : vector<2x64xf32> to vector<1x64xf32>
    %c4_52 = arith.constant 4 : index
    %c0_53 = arith.constant 0 : index
    %117 = vector.load %arg18[%c4_52, %c0_53] : memref<16x64xf32, #tpu.memory_space<vmem>>, vector<1x64xf32>
    tpu.vector_store %arg18[%c4_52, %c0_53], %116 {strides = array<i32>} : memref<16x64xf32, #tpu.memory_space<vmem>>, vector<1x64xf32>,
    %118 = vector.extract_strided_slice %115 {offsets = [1, 0], sizes = [1, 64], strides = [1, 1]} : vector<2x64xf32> to vector<1x64xf32>
    %c12_54 = arith.constant 12 : index
    %c0_55 = arith.constant 0 : index
    %119 = vector.load %arg18[%c12_54, %c0_55] : memref<16x64xf32, #tpu.memory_space<vmem>>, vector<1x64xf32>
    tpu.vector_store %arg18[%c12_54, %c0_55], %118 {strides = array<i32>} : memref<16x64xf32, #tpu.memory_space<vmem>>, vector<1x64xf32>,
    %120 = vector.extract_strided_slice %77 {offsets = [10, 0], sizes = [2, 64], strides = [1, 1]} : vector<16x64xf32> to vector<2x64xf32>
    %cst_56 = arith.constant dense<0.000000e+00> : vector<2x64xf32>
    %121 = tpu.matmul %115, %78, %cst_56 {dimension_numbers = #tpu.dot_dimension_numbers<[1], [0], [0], [1], [0, 0, 1, 1], [], []>} : vector<2x64xf32>, vector<64x64xf32>, vector<2x64xf32> -> vector<2x64xf32>
    %122 = arith.addf %120, %121 : vector<2x64xf32>
    %123 = math.tanh %122 : vector<2x64xf32>
    %124 = vector.extract_strided_slice %123 {offsets = [0, 0], sizes = [1, 64], strides = [1, 1]} : vector<2x64xf32> to vector<1x64xf32>
    %c5 = arith.constant 5 : index
    %c0_57 = arith.constant 0 : index
    %125 = vector.load %arg18[%c5, %c0_57] : memref<16x64xf32, #tpu.memory_space<vmem>>, vector<1x64xf32>
    tpu.vector_store %arg18[%c5, %c0_57], %124 {strides = array<i32>} : memref<16x64xf32, #tpu.memory_space<vmem>>, vector<1x64xf32>,
    %126 = vector.extract_strided_slice %123 {offsets = [1, 0], sizes = [1, 64], strides = [1, 1]} : vector<2x64xf32> to vector<1x64xf32>
    %c13 = arith.constant 13 : index
    %c0_58 = arith.constant 0 : index
    %127 = vector.load %arg18[%c13, %c0_58] : memref<16x64xf32, #tpu.memory_space<vmem>>, vector<1x64xf32>
    tpu.vector_store %arg18[%c13, %c0_58], %126 {strides = array<i32>} : memref<16x64xf32, #tpu.memory_space<vmem>>, vector<1x64xf32>,
    %128 = vector.extract_strided_slice %77 {offsets = [12, 0], sizes = [2, 64], strides = [1, 1]} : vector<16x64xf32> to vector<2x64xf32>
    %cst_59 = arith.constant dense<0.000000e+00> : vector<2x64xf32>
    %129 = tpu.matmul %123, %78, %cst_59 {dimension_numbers = #tpu.dot_dimension_numbers<[1], [0], [0], [1], [0, 0, 1, 1], [], []>} : vector<2x64xf32>, vector<64x64xf32>, vector<2x64xf32> -> vector<2x64xf32>
    %130 = arith.addf %128, %129 : vector<2x64xf32>
    %131 = math.tanh %130 : vector<2x64xf32>
    %132 = vector.extract_strided_slice %131 {offsets = [0, 0], sizes = [1, 64], strides = [1, 1]} : vector<2x64xf32> to vector<1x64xf32>
    %c6_60 = arith.constant 6 : index
    %c0_61 = arith.constant 0 : index
    %133 = vector.load %arg18[%c6_60, %c0_61] : memref<16x64xf32, #tpu.memory_space<vmem>>, vector<1x64xf32>
    tpu.vector_store %arg18[%c6_60, %c0_61], %132 {strides = array<i32>} : memref<16x64xf32, #tpu.memory_space<vmem>>, vector<1x64xf32>,
    %134 = vector.extract_strided_slice %131 {offsets = [1, 0], sizes = [1, 64], strides = [1, 1]} : vector<2x64xf32> to vector<1x64xf32>
    %c14_62 = arith.constant 14 : index
    %c0_63 = arith.constant 0 : index
    %135 = vector.load %arg18[%c14_62, %c0_63] : memref<16x64xf32, #tpu.memory_space<vmem>>, vector<1x64xf32>
    tpu.vector_store %arg18[%c14_62, %c0_63], %134 {strides = array<i32>} : memref<16x64xf32, #tpu.memory_space<vmem>>, vector<1x64xf32>,
    %136 = vector.extract_strided_slice %77 {offsets = [14, 0], sizes = [2, 64], strides = [1, 1]} : vector<16x64xf32> to vector<2x64xf32>
    %cst_64 = arith.constant dense<0.000000e+00> : vector<2x64xf32>
    %137 = tpu.matmul %131, %78, %cst_64 {dimension_numbers = #tpu.dot_dimension_numbers<[1], [0], [0], [1], [0, 0, 1, 1], [], []>} : vector<2x64xf32>, vector<64x64xf32>, vector<2x64xf32> -> vector<2x64xf32>
    %138 = arith.addf %136, %137 : vector<2x64xf32>
    %139 = math.tanh %138 : vector<2x64xf32>
    %140 = vector.extract_strided_slice %139 {offsets = [0, 0], sizes = [1, 64], strides = [1, 1]} : vector<2x64xf32> to vector<1x64xf32>
    %c7 = arith.constant 7 : index
    %c0_65 = arith.constant 0 : index
    %141 = vector.load %arg18[%c7, %c0_65] : memref<16x64xf32, #tpu.memory_space<vmem>>, vector<1x64xf32>
    tpu.vector_store %arg18[%c7, %c0_65], %140 {strides = array<i32>} : memref<16x64xf32, #tpu.memory_space<vmem>>, vector<1x64xf32>,
    %142 = vector.extract_strided_slice %139 {offsets = [1, 0], sizes = [1, 64], strides = [1, 1]} : vector<2x64xf32> to vector<1x64xf32>
    %c15 = arith.constant 15 : index
    %c0_66 = arith.constant 0 : index
    %143 = vector.load %arg18[%c15, %c0_66] : memref<16x64xf32, #tpu.memory_space<vmem>>, vector<1x64xf32>
    tpu.vector_store %arg18[%c15, %c0_66], %142 {strides = array<i32>} : memref<16x64xf32, #tpu.memory_space<vmem>>, vector<1x64xf32>,
    %c0_67 = arith.constant 0 : index
    %c0_68 = arith.constant 0 : index
    %144 = vector.load %arg7[%c0_67, %c0_68] : memref<6x8xf32, #tpu.memory_space<vmem>>, vector<6x8xf32>
    %c0_69 = arith.constant 0 : index
    %c0_70 = arith.constant 0 : index
    %145 = vector.load %arg8[%c0_69, %c0_70] : memref<6x32xf32, #tpu.memory_space<vmem>>, vector<6x32xf32>
    %c0_71 = arith.constant 0 : index
    %c0_72 = arith.constant 0 : index
    %146 = vector.load %arg9[%c0_71, %c0_72] : memref<6x8xf32, #tpu.memory_space<vmem>>, vector<6x8xf32>
    %c0_73 = arith.constant 0 : index
    %c0_74 = arith.constant 0 : index
    %147 = vector.load %arg10[%c0_73, %c0_74] : memref<6x32xf32, #tpu.memory_space<vmem>>, vector<6x32xf32>
    %c0_75 = arith.constant 0 : index
    %c0_76 = arith.constant 0 : index
    %148 = vector.load %arg11[%c0_75, %c0_76] : memref<32x16xf32, #tpu.memory_space<vmem>>, vector<32x16xf32>
    %c0_77 = arith.constant 0 : index
    %c0_78 = arith.constant 0 : index
    %149 = vector.load %arg12[%c0_77, %c0_78] : memref<32x16xf32, #tpu.memory_space<vmem>>, vector<32x16xf32>
    %c0_79 = arith.constant 0 : index
    %c0_80 = arith.constant 0 : index
    %150 = vector.load %arg18[%c0_79, %c0_80] : memref<16x64xf32, #tpu.memory_space<vmem>>, vector<8x64xf32>
    %151 = vector.extract_strided_slice %150 {offsets = [0, 0], sizes = [8, 32], strides = [1, 1]} : vector<8x64xf32> to vector<8x32xf32>
    %152 = vector.extract_strided_slice %150 {offsets = [0, 32], sizes = [8, 32], strides = [1, 1]} : vector<8x64xf32> to vector<8x32xf32>
    %cst_81 = arith.constant dense<0.000000e+00> : vector<6x32xf32>
    %153 = tpu.matmul %144, %151, %cst_81 {dimension_numbers = #tpu.dot_dimension_numbers<[1], [0], [0], [1], [0, 0, 1, 1], [], []>} : vector<6x8xf32>, vector<8x32xf32>, vector<6x32xf32> -> vector<6x32xf32>
    %cst_82 = arith.constant dense<0.000000e+00> : vector<6x32xf32>
    %154 = tpu.matmul %146, %152, %cst_82 {dimension_numbers = #tpu.dot_dimension_numbers<[1], [0], [0], [1], [0, 0, 1, 1], [], []>} : vector<6x8xf32>, vector<8x32xf32>, vector<6x32xf32> -> vector<6x32xf32>
    %cst_83 = arith.constant 0.000000e+00 : f32
    %155 = vector.broadcast %cst_83 : f32 to vector<6x32xf32>
    %156 = arith.cmpf ogt, %153, %155 : vector<6x32xf32>
    %cst_84 = arith.constant 0.00999999977 : f32
    %157 = vector.broadcast %cst_84 : f32 to vector<6x32xf32>
    %158 = arith.mulf %157, %153 : vector<6x32xf32>
    %159 = arith.select %156, %153, %158 : vector<6x32xi1>, vector<6x32xf32>
    %160 = arith.addf %159, %145 : vector<6x32xf32>
    %cst_85 = arith.constant 0.000000e+00 : f32
    %161 = vector.broadcast %cst_85 : f32 to vector<6x32xf32>
    %162 = arith.cmpf ogt, %154, %161 : vector<6x32xf32>
    %cst_86 = arith.constant 0.00999999977 : f32
    %163 = vector.broadcast %cst_86 : f32 to vector<6x32xf32>
    %164 = arith.mulf %163, %154 : vector<6x32xf32>
    %165 = arith.select %162, %154, %164 : vector<6x32xi1>, vector<6x32xf32>
    %166 = arith.addf %165, %147 : vector<6x32xf32>
    %cst_87 = arith.constant dense<0.000000e+00> : vector<6x16xf32>
    %167 = tpu.matmul %160, %148, %cst_87 {dimension_numbers = #tpu.dot_dimension_numbers<[1], [0], [0], [1], [0, 0, 1, 1], [], []>} : vector<6x32xf32>, vector<32x16xf32>, vector<6x16xf32> -> vector<6x16xf32>
    %cst_88 = arith.constant dense<0.000000e+00> : vector<6x16xf32>
    %168 = tpu.matmul %166, %149, %cst_88 {dimension_numbers = #tpu.dot_dimension_numbers<[1], [0], [0], [1], [0, 0, 1, 1], [], []>} : vector<6x32xf32>, vector<32x16xf32>, vector<6x16xf32> -> vector<6x16xf32>
    %169 = arith.addf %167, %168 : vector<6x16xf32>
    %170 = vector.extract_strided_slice %169 {offsets = [0, 0], sizes = [1, 16], strides = [1, 1]} : vector<6x16xf32> to vector<1x16xf32>
    %c0_89 = arith.constant 0 : index
    %c0_90 = arith.constant 0 : index
    %171 = vector.load %arg19[%c0_89, %c0_90] : memref<2x96xf32, #tpu.memory_space<vmem>>, vector<1x16xf32>
    tpu.vector_store %arg19[%c0_89, %c0_90], %170 {strides = array<i32>} : memref<2x96xf32, #tpu.memory_space<vmem>>, vector<1x16xf32>,
    %172 = vector.extract_strided_slice %169 {offsets = [1, 0], sizes = [1, 16], strides = [1, 1]} : vector<6x16xf32> to vector<1x16xf32>
    %c0_91 = arith.constant 0 : index
    %c16 = arith.constant 16 : index
    %173 = vector.load %arg19[%c0_91, %c16] : memref<2x96xf32, #tpu.memory_space<vmem>>, vector<1x16xf32>
    tpu.vector_store %arg19[%c0_91, %c16], %172 {strides = array<i32>} : memref<2x96xf32, #tpu.memory_space<vmem>>, vector<1x16xf32>,
    %174 = vector.extract_strided_slice %169 {offsets = [2, 0], sizes = [1, 16], strides = [1, 1]} : vector<6x16xf32> to vector<1x16xf32>
    %c0_92 = arith.constant 0 : index
    %c32 = arith.constant 32 : index
    %175 = vector.load %arg19[%c0_92, %c32] : memref<2x96xf32, #tpu.memory_space<vmem>>, vector<1x16xf32>
    tpu.vector_store %arg19[%c0_92, %c32], %174 {strides = array<i32>} : memref<2x96xf32, #tpu.memory_space<vmem>>, vector<1x16xf32>,
    %176 = vector.extract_strided_slice %169 {offsets = [3, 0], sizes = [1, 16], strides = [1, 1]} : vector<6x16xf32> to vector<1x16xf32>
    %c0_93 = arith.constant 0 : index
    %c48 = arith.constant 48 : index
    %177 = vector.load %arg19[%c0_93, %c48] : memref<2x96xf32, #tpu.memory_space<vmem>>, vector<1x16xf32>
    tpu.vector_store %arg19[%c0_93, %c48], %176 {strides = array<i32>} : memref<2x96xf32, #tpu.memory_space<vmem>>, vector<1x16xf32>,
    %178 = vector.extract_strided_slice %169 {offsets = [4, 0], sizes = [1, 16], strides = [1, 1]} : vector<6x16xf32> to vector<1x16xf32>
    %c0_94 = arith.constant 0 : index
    %c64 = arith.constant 64 : index
    %179 = vector.load %arg19[%c0_94, %c64] : memref<2x96xf32, #tpu.memory_space<vmem>>, vector<1x16xf32>
    tpu.vector_store %arg19[%c0_94, %c64], %178 {strides = array<i32>} : memref<2x96xf32, #tpu.memory_space<vmem>>, vector<1x16xf32>,
    %180 = vector.extract_strided_slice %169 {offsets = [5, 0], sizes = [1, 16], strides = [1, 1]} : vector<6x16xf32> to vector<1x16xf32>
    %c0_95 = arith.constant 0 : index
    %c80 = arith.constant 80 : index
    %181 = vector.load %arg19[%c0_95, %c80] : memref<2x96xf32, #tpu.memory_space<vmem>>, vector<1x16xf32>
    tpu.vector_store %arg19[%c0_95, %c80], %180 {strides = array<i32>} : memref<2x96xf32, #tpu.memory_space<vmem>>, vector<1x16xf32>,
    %c8_96 = arith.constant 8 : index
    %c0_97 = arith.constant 0 : index
    %182 = vector.load %arg18[%c8_96, %c0_97] : memref<16x64xf32, #tpu.memory_space<vmem>>, vector<8x64xf32>
    %183 = vector.extract_strided_slice %182 {offsets = [0, 0], sizes = [8, 32], strides = [1, 1]} : vector<8x64xf32> to vector<8x32xf32>
    %184 = vector.extract_strided_slice %182 {offsets = [0, 32], sizes = [8, 32], strides = [1, 1]} : vector<8x64xf32> to vector<8x32xf32>
    %cst_98 = arith.constant dense<0.000000e+00> : vector<6x32xf32>
    %185 = tpu.matmul %144, %183, %cst_98 {dimension_numbers = #tpu.dot_dimension_numbers<[1], [0], [0], [1], [0, 0, 1, 1], [], []>} : vector<6x8xf32>, vector<8x32xf32>, vector<6x32xf32> -> vector<6x32xf32>
    %cst_99 = arith.constant dense<0.000000e+00> : vector<6x32xf32>
    %186 = tpu.matmul %146, %184, %cst_99 {dimension_numbers = #tpu.dot_dimension_numbers<[1], [0], [0], [1], [0, 0, 1, 1], [], []>} : vector<6x8xf32>, vector<8x32xf32>, vector<6x32xf32> -> vector<6x32xf32>
    %cst_100 = arith.constant 0.000000e+00 : f32
    %187 = vector.broadcast %cst_100 : f32 to vector<6x32xf32>
    %188 = arith.cmpf ogt, %185, %187 : vector<6x32xf32>
    %cst_101 = arith.constant 0.00999999977 : f32
    %189 = vector.broadcast %cst_101 : f32 to vector<6x32xf32>
    %190 = arith.mulf %189, %185 : vector<6x32xf32>
    %191 = arith.select %188, %185, %190 : vector<6x32xi1>, vector<6x32xf32>
    %192 = arith.addf %191, %145 : vector<6x32xf32>
    %cst_102 = arith.constant 0.000000e+00 : f32
    %193 = vector.broadcast %cst_102 : f32 to vector<6x32xf32>
    %194 = arith.cmpf ogt, %186, %193 : vector<6x32xf32>
    %cst_103 = arith.constant 0.00999999977 : f32
    %195 = vector.broadcast %cst_103 : f32 to vector<6x32xf32>
    %196 = arith.mulf %195, %186 : vector<6x32xf32>
    %197 = arith.select %194, %186, %196 : vector<6x32xi1>, vector<6x32xf32>
    %198 = arith.addf %197, %147 : vector<6x32xf32>
    %cst_104 = arith.constant dense<0.000000e+00> : vector<6x16xf32>
    %199 = tpu.matmul %192, %148, %cst_104 {dimension_numbers = #tpu.dot_dimension_numbers<[1], [0], [0], [1], [0, 0, 1, 1], [], []>} : vector<6x32xf32>, vector<32x16xf32>, vector<6x16xf32> -> vector<6x16xf32>
    %cst_105 = arith.constant dense<0.000000e+00> : vector<6x16xf32>
    %200 = tpu.matmul %198, %149, %cst_105 {dimension_numbers = #tpu.dot_dimension_numbers<[1], [0], [0], [1], [0, 0, 1, 1], [], []>} : vector<6x32xf32>, vector<32x16xf32>, vector<6x16xf32> -> vector<6x16xf32>
    %201 = arith.addf %199, %200 : vector<6x16xf32>
    %202 = vector.extract_strided_slice %201 {offsets = [0, 0], sizes = [1, 16], strides = [1, 1]} : vector<6x16xf32> to vector<1x16xf32>
    %c1_106 = arith.constant 1 : index
    %c0_107 = arith.constant 0 : index
    %203 = vector.load %arg19[%c1_106, %c0_107] : memref<2x96xf32, #tpu.memory_space<vmem>>, vector<1x16xf32>
    tpu.vector_store %arg19[%c1_106, %c0_107], %202 {strides = array<i32>} : memref<2x96xf32, #tpu.memory_space<vmem>>, vector<1x16xf32>,
    %204 = vector.extract_strided_slice %201 {offsets = [1, 0], sizes = [1, 16], strides = [1, 1]} : vector<6x16xf32> to vector<1x16xf32>
    %c1_108 = arith.constant 1 : index
    %c16_109 = arith.constant 16 : index
    %205 = vector.load %arg19[%c1_108, %c16_109] : memref<2x96xf32, #tpu.memory_space<vmem>>, vector<1x16xf32>
    tpu.vector_store %arg19[%c1_108, %c16_109], %204 {strides = array<i32>} : memref<2x96xf32, #tpu.memory_space<vmem>>, vector<1x16xf32>,
    %206 = vector.extract_strided_slice %201 {offsets = [2, 0], sizes = [1, 16], strides = [1, 1]} : vector<6x16xf32> to vector<1x16xf32>
    %c1_110 = arith.constant 1 : index
    %c32_111 = arith.constant 32 : index
    %207 = vector.load %arg19[%c1_110, %c32_111] : memref<2x96xf32, #tpu.memory_space<vmem>>, vector<1x16xf32>
    tpu.vector_store %arg19[%c1_110, %c32_111], %206 {strides = array<i32>} : memref<2x96xf32, #tpu.memory_space<vmem>>, vector<1x16xf32>,
    %208 = vector.extract_strided_slice %201 {offsets = [3, 0], sizes = [1, 16], strides = [1, 1]} : vector<6x16xf32> to vector<1x16xf32>
    %c1_112 = arith.constant 1 : index
    %c48_113 = arith.constant 48 : index
    %209 = vector.load %arg19[%c1_112, %c48_113] : memref<2x96xf32, #tpu.memory_space<vmem>>, vector<1x16xf32>
    tpu.vector_store %arg19[%c1_112, %c48_113], %208 {strides = array<i32>} : memref<2x96xf32, #tpu.memory_space<vmem>>, vector<1x16xf32>,
    %210 = vector.extract_strided_slice %201 {offsets = [4, 0], sizes = [1, 16], strides = [1, 1]} : vector<6x16xf32> to vector<1x16xf32>
    %c1_114 = arith.constant 1 : index
    %c64_115 = arith.constant 64 : index
    %211 = vector.load %arg19[%c1_114, %c64_115] : memref<2x96xf32, #tpu.memory_space<vmem>>, vector<1x16xf32>
    tpu.vector_store %arg19[%c1_114, %c64_115], %210 {strides = array<i32>} : memref<2x96xf32, #tpu.memory_space<vmem>>, vector<1x16xf32>,
    %212 = vector.extract_strided_slice %201 {offsets = [5, 0], sizes = [1, 16], strides = [1, 1]} : vector<6x16xf32> to vector<1x16xf32>
    %c1_116 = arith.constant 1 : index
    %c80_117 = arith.constant 80 : index
    %213 = vector.load %arg19[%c1_116, %c80_117] : memref<2x96xf32, #tpu.memory_space<vmem>>, vector<1x16xf32>
    tpu.vector_store %arg19[%c1_116, %c80_117], %212 {strides = array<i32>} : memref<2x96xf32, #tpu.memory_space<vmem>>, vector<1x16xf32>,
    %c0_118 = arith.constant 0 : index
    %c0_119 = arith.constant 0 : index
    %214 = vector.load %arg19[%c0_118, %c0_119] : memref<2x96xf32, #tpu.memory_space<vmem>>, vector<2x96xf32>
    %c0_120 = arith.constant 0 : index
    %c0_121 = arith.constant 0 : index
    %215 = vector.load %arg13[%c0_120, %c0_121] : memref<96x5xf32, #tpu.memory_space<vmem>>, vector<96x5xf32>
    %cst_122 = arith.constant dense<0.000000e+00> : vector<2x5xf32>
    %216 = tpu.matmul %214, %215, %cst_122 {dimension_numbers = #tpu.dot_dimension_numbers<[1], [0], [0], [1], [0, 0, 1, 1], [], []>} : vector<2x96xf32>, vector<96x5xf32>, vector<2x5xf32> -> vector<2x5xf32>
    %c0_123 = arith.constant 0 : index
    %c0_124 = arith.constant 0 : index
    %217 = vector.load %arg14[%c0_123, %c0_124] : memref<1x5xf32, #tpu.memory_space<vmem>>, vector<1x5xf32>
    %218 = vector.broadcast %217 : vector<1x5xf32> to vector<2x5xf32>
    %219 = arith.addf %216, %218 : vector<2x5xf32>
    %220 = vector.extract_strided_slice %219 {offsets = [0, 0], sizes = [2, 3], strides = [1, 1]} : vector<2x5xf32> to vector<2x3xf32>
    %221 = vector.extract_strided_slice %219 {offsets = [0, 3], sizes = [2, 2], strides = [1, 1]} : vector<2x5xf32> to vector<2x2xf32>
    %cst_125 = arith.constant dense<0xFF800000> : vector<2xf32>
    %222 = vector.multi_reduction <maximumf>, %220, %cst_125 [1] : vector<2x3xf32> to vector<2xf32>
    %223 = vector.shape_cast %222 : vector<2xf32> to vector<2x1xf32>
    %224 = vector.broadcast %223 : vector<2x1xf32> to vector<2x3xf32>
    %225 = arith.subf %220, %224 : vector<2x3xf32>
    %226 = math.exp %225 : vector<2x3xf32>
    %cst_126 = arith.constant dense<0.000000e+00> : vector<2xf32>
    %227 = vector.multi_reduction <add>, %226, %cst_126 [1] : vector<2x3xf32> to vector<2xf32>
    %228 = vector.shape_cast %227 : vector<2xf32> to vector<2x1xf32>
    %229 = math.log %228 : vector<2x1xf32>
    %230 = vector.broadcast %229 : vector<2x1xf32> to vector<2x3xf32>
    %231 = arith.subf %225, %230 : vector<2x3xf32>
    %c0_127 = arith.constant 0 : index
    %c0_128 = arith.constant 0 : index
    %232 = vector.load %arg15[%c0_127, %c0_128] : memref<2x3xf32, #tpu.memory_space<vmem>>, vector<2x3xf32>
    tpu.vector_store %arg15[%c0_127, %c0_128], %231 {strides = array<i32>} : memref<2x3xf32, #tpu.memory_space<vmem>>, vector<2x3xf32>,
    %cst_129 = arith.constant dense<0xFF800000> : vector<2xf32>
    %233 = vector.multi_reduction <maximumf>, %221, %cst_129 [1] : vector<2x2xf32> to vector<2xf32>
    %234 = vector.shape_cast %233 : vector<2xf32> to vector<2x1xf32>
    %235 = vector.broadcast %234 : vector<2x1xf32> to vector<2x2xf32>
    %236 = arith.subf %221, %235 : vector<2x2xf32>
    %237 = math.exp %236 : vector<2x2xf32>
    %cst_130 = arith.constant dense<0.000000e+00> : vector<2xf32>
    %238 = vector.multi_reduction <add>, %237, %cst_130 [1] : vector<2x2xf32> to vector<2xf32>
    %239 = vector.shape_cast %238 : vector<2xf32> to vector<2x1xf32>
    %240 = math.log %239 : vector<2x1xf32>
    %241 = vector.broadcast %240 : vector<2x1xf32> to vector<2x2xf32>
    %242 = arith.subf %236, %241 : vector<2x2xf32>
    %c0_131 = arith.constant 0 : index
    %c0_132 = arith.constant 0 : index
    %243 = vector.load %arg16[%c0_131, %c0_132] : memref<2x2xf32, #tpu.memory_space<vmem>>, vector<2x2xf32>
    tpu.vector_store %arg16[%c0_131, %c0_132], %242 {strides = array<i32>} : memref<2x2xf32, #tpu.memory_space<vmem>>, vector<2x2xf32>,
    return
  }
}

</mosaic_0001>

<bundles_post_ra>
// kernel: bihdm_forward.1
= control target key start
LH: loop header
LB: loop body
LE: loop exit
PB: predicated region body
PF: predicated region fallthrough
CT: control target
= control target key end

     0   :  { %s4350_s0 = inlined_call_operand.vmem [shape: f32[16,32], index: 0, kind: input, shape index: {}]   ;;  %s4351_s1 = inlined_call_operand.vmem [shape: f32[32,128], index: 1, kind: input, shape index: {}]   ;;  %s4352_s2 = inlined_call_operand.vmem [shape: f32[128,128], index: 2, kind: input, shape index: {}]   ;;  %s4353_s3 = inlined_call_operand.vmem [shape: f32[1,128], index: 3, kind: input, shape index: {}]   ;;  %s4354_s4 = inlined_call_operand.vmem [shape: f32[32,64], index: 4, kind: input, shape index: {}]   ;;  %s4355_s5 = inlined_call_operand.vmem [shape: f32[64,64], index: 5, kind: input, shape index: {}]   ;;  %s4356_s6 = inlined_call_operand.vmem [shape: f32[1,64], index: 6, kind: input, shape index: {}]   ;;  %s4357_s7 = inlined_call_operand.vmem [shape: f32[6,8], index: 7, kind: input, shape index: {}]   ;;  %s4358_s8 = inlined_call_operand.vmem [shape: f32[6,32], index: 8, kind: input, shape index: {}]   ;;  %s4359_s9 = inlined_call_operand.vmem [shape: f32[6,8], index: 9, kind: input, shape index: {}]   ;;  %s4360_s10 = inlined_call_operand.vmem [shape: f32[6,32], index: 10, kind: input, shape index: {}]   ;;  %s4361_s11 = inlined_call_operand.vmem [shape: f32[32,16], index: 11, kind: input, shape index: {}]   ;;  %s4362_s12 = inlined_call_operand.vmem [shape: f32[32,16], index: 12, kind: input, shape index: {}]   ;;  %s4363_s13 = inlined_call_operand.vmem [shape: f32[96,5], index: 13, kind: input, shape index: {}]   ;;  %s4364_s14 = inlined_call_operand.vmem [shape: f32[1,5], index: 14, kind: input, shape index: {}]   ;;  %s4365_s15 = inlined_call_operand.hbm [shape: f32[2,3], index: 15, kind: output, shape index: {0}]   ;;  %s4366_s16 = inlined_call_operand.hbm [shape: f32[2,2], index: 16, kind: output, shape index: {1}]  }
   0x1   :  { %4368 = sst [smem:[#allocation11_spill]] %s4350_s0 }
   0x2   :  { %22 = vsyncpa [#allocation6], 0  ;;  %v56_v0 = vld [vmem:[%s4351_s1] sm:$0xff]  ;;  %v57_v1 = vld [vmem:[%s4351_s1 + $0x8] sm:$0xff]  ;;  %vm67_vm0 = vcmask 261120   ;;  %s4369_s0 = sld [smem:[#allocation11_spill]] }
   0x3   :  { %v58_v2 = vld [vmem:[%s4351_s1 + $0x10] sm:$0xff]  ;;  %v3226_v3 = vpack.c.bf16 %v57_v1, %v56_v0  ;;  %v59_v4 = vld [vmem:[%s4351_s1 + $0x18] sm:$0xff]  ;;  %v3676_v6 = vmov 0.0|0.0   ;;  %v149_v8 = vld [vmem:[%s4352_s2] sm:$0xff]  ;;  %vm3677_vm1 = vmmov 0   ;;  %v3678_v10 = vmov 0.0  }
   0x4   :  { %3258 = vmatprep.subr.bf16.mxu0 %v3676_v6  ;;  %v3230_v7 = vpack.c.bf16 %v59_v4, %v58_v2  ;;  %v150_v9 = vld [vmem:[%s4352_s2 + $0x8] sm:$0xff]  ;;  %2759 = vmatprep.mubr.msk.f32.mxu0 %vm3677_vm1, %v3678_v10  ;;  %v151_v12 = vld [vmem:[%s4352_s2 + $0x10] sm:$0xff]  ;;  %v152_v13 = vld [vmem:[%s4352_s2 + $0x18] sm:$0xff] }
   0x5   :  { %3227 = vmatprep.subr.bf16.mxu1 %v3226_v3  ;;  %v3798_v11 = vpack.c.bf16 %v150_v9, %v149_v8  ;;  %v3808_v14 = vpack.c.bf16 %v152_v13, %v151_v12 }
   0x6   :  { %3229 = vmatpush3.bf16.msra.mxu1 %v3226_v3 }
   0x7   :  { %3231 = vmatprep.subr.bf16.mxu1 %v3230_v7  ;;  %3260 = vmatpush3.bf16.msra.mxu0 %v3798_v11 }
   0x8   :  { %v54_v5 = vld [vmem:[%s4369_s0] sm:$0xff]  ;;  %3261 = vmatprep.subr.bf16.mxu0 %v3676_v6 }
   0x9   :  { %2689 = vmatprep.mubr.msk.f32.mxu1 %vm67_vm0, %v54_v5 }
   0xa   :  { %23 = vsyncpa [#allocation8], 0  ;;  %3233 = vmatpush3.bf16.msra.mxu1 %v3230_v7  ;;  %v55_v15 = vld [vmem:[%s4369_s0 + $0x8] sm:$0xff]  ;;  %v153_v16 = vld [vmem:[%s4352_s2 + $0x20] sm:$0xff]  ;;  %s3679_s20 = smov 96   ;;  %vm242_vm2 = vcmask 254976  }
   0xb   :  { %v154_v17 = vld [vmem:[%s4352_s2 + $0x28] sm:$0xff]  ;;  %3234 = vmatprep.subr.bf16.mxu1 %v3676_v6  ;;  %3263 = vmatpush3.bf16.msra.mxu0 %v3808_v14  ;;  %v155_v19 = vld [vmem:[%s4352_s2 + $0x30] sm:$0xff]  ;;  %v156_v20 = vld [vmem:[%s4352_s2 + $0x38] sm:$0xff]  ;;  %vm324_vm3 = vcmask 257026   ;;  %vm408_vm4 = vcmask 259076   ;;  %vm492_vm5 = vcmask 261126  }
   0xc   :  { %3264 = vmatprep.subr.bf16.mxu0 %v3676_v6  ;;  %v3823_v18 = vpack.c.bf16 %v154_v17, %v153_v16  ;;  %v3837_v21 = vpack.c.bf16 %v156_v20, %v155_v19  ;;  %v157_v22 = vld [vmem:[%s4352_s2 + $0x40] sm:$0xff]  ;;  %v158_v23 = vld [vmem:[%s4352_s2 + $0x48] sm:$0xff]  ;;  %v159_v25 = vld [vmem:[%s4352_s2 + $0x50] sm:$0xff]  ;;  %vm999_vm6 = vcmask 516096   ;;  %vm1001_vm7 = vcmask 517121   ;;  %s3680_s30 = smov 16  }
   0xd   :  { %2690 = vmatmul.mubr.msk.f32.vlgmr.msra.gmra.mrb[0].mxu1 %vm67_vm0, %v55_v15  ;;  %v3849_v24 = vpack.c.bf16 %v158_v23, %v157_v22  ;;  %v160_v26 = vld [vmem:[%s4352_s2 + $0x58] sm:$0xff]  ;;  %v161_v28 = vld [vmem:[%s4352_s2 + $0x60] sm:$0xff]  ;;  %v162_v29 = vld [vmem:[%s4352_s2 + $0x68] sm:$0xff]  ;;  %vm923_vm8 = vcmask 523264   ;;  %vm1081_vm9 = vcmask 518146   ;;  %vm1083_vm10 = vcmask 519171  }
   0xe   :  { %3236 = vmatpush3.bf16.msra.mxu1 %v3798_v11  ;;  %2724 = vmatprep.mubr.msk.f32.mxu1 %vm3677_vm1, %v3678_v10  ;;  %v3861_v27 = vpack.c.bf16 %v160_v26, %v159_v25  ;;  %v3873_v30 = vpack.c.bf16 %v162_v29, %v161_v28  ;;  %v163_v31 = vld [vmem:[%s4352_s2 + $0x70] sm:$0xff]  ;;  %v164_v32 = vld [vmem:[%s4352_s2 + $0x78] sm:$0xff]  ;;  %v2397_v34 = vld [vmem:[%s4353_s3] ss:$0 sm:$0xff]  ;;  %vm1164_vm11 = vcmask 520196   ;;  %vm1166_vm12 = vcmask 521221  }
   0xf   :  { %3237 = vmatprep.subr.bf16.mxu1 %v3676_v6  ;;  %3266 = vmatpush3.bf16.msra.mxu0 %v3823_v18  ;;  %v3885_v33 = vpack.c.bf16 %v164_v32, %v163_v31  ;;  %v915_v28 = vld [vmem:[%s4355_s5] sm:$0xff]  ;;  %v916_v29 = vld [vmem:[%s4355_s5 + $0x8] sm:$0xff]  ;;  %vm1247_vm13 = vcmask 522246   ;;  %vm1249_vm14 = vcmask 523271   ;;  %vm1584_vm15 = vcmask 64512   ;;  %s3682_s1 = smov 48  }
  0x10   :  { %3267 = vmatprep.subr.bf16.mxu0 %v3676_v6 }
  0x12   :  { %3239 = vmatpush3.bf16.msra.mxu1 %v3808_v14 }
  0x13   :  { %3240 = vmatprep.subr.bf16.mxu1 %v3676_v6  ;;  %3269 = vmatpush3.bf16.msra.mxu0 %v3837_v21 }
  0x14   :  { %3270 = vmatprep.subr.bf16.mxu0 %v3676_v6 }
  0x16   :  { %3242 = vmatpush3.bf16.msra.mxu1 %v3823_v18 }
  0x17   :  { %3243 = vmatprep.subr.bf16.mxu1 %v3676_v6  ;;  %3272 = vmatpush3.bf16.msra.mxu0 %v3849_v24 }
  0x18   :  { %3273 = vmatprep.subr.bf16.mxu0 %v3676_v6 }
  0x1a   :  { %3245 = vmatpush3.bf16.msra.mxu1 %v3837_v21 }
  0x1b   :  { %3246 = vmatprep.subr.bf16.mxu1 %v3676_v6  ;;  %3275 = vmatpush3.bf16.msra.mxu0 %v3861_v27 }
  0x1c   :  { %3276 = vmatprep.subr.bf16.mxu0 %v3676_v6 }
  0x1e   :  { %3248 = vmatpush3.bf16.msra.mxu1 %v3849_v24 }
  0x1f   :  { %3249 = vmatprep.subr.bf16.mxu1 %v3676_v6  ;;  %3278 = vmatpush3.bf16.msra.mxu0 %v3873_v30 }
  0x20   :  { %3279 = vmatprep.subr.bf16.mxu0 %v3676_v6 }
  0x22   :  { %3251 = vmatpush3.bf16.msra.mxu1 %v3861_v27 }
  0x23   :  { %3252 = vmatprep.subr.bf16.mxu1 %v3676_v6  ;;  %3281 = vmatpush3.bf16.msra.mxu0 %v3885_v33 }
  0x24   :  { %3306 = vmatprep.subr.bf16.mxu0 %v3676_v6 }
  0x26   :  { %3254 = vmatpush3.bf16.msra.mxu1 %v3873_v30 }
  0x27   :  { %3255 = vmatprep.subr.bf16.mxu1 %v3676_v6 }
  0x2a   :  { %3257 = vmatpush3.bf16.msra.mxu1 %v3885_v33 }
  0x2b   :  { %3282 = vmatprep.subr.bf16.mxu1 %v3676_v6 }
  0x2d   :  { %2725 = vmatmul.mubr.f32.vlgmr.msra.gmra.mrb[2].mxu1 %v3678_v10 }
  0x2e   :  { %3284 = vmatpush3.bf16.msra.mxu1 %v3798_v11  ;;  %2794 = vmatprep.mubr.msk.f32.mxu1 %vm3677_vm1, %v3678_v10 }
  0x2f   :  { %3285 = vmatprep.subr.bf16.mxu1 %v3676_v6 }
  0x32   :  { %3287 = vmatpush3.bf16.msra.mxu1 %v3808_v14 }
  0x33   :  { %3288 = vmatprep.subr.bf16.mxu1 %v3676_v6 }
  0x36   :  { %3290 = vmatpush3.bf16.msra.mxu1 %v3823_v18 }
  0x37   :  { %3291 = vmatprep.subr.bf16.mxu1 %v3676_v6 }
  0x3a   :  { %3293 = vmatpush3.bf16.msra.mxu1 %v3837_v21 }
  0x3b   :  { %3294 = vmatprep.subr.bf16.mxu1 %v3676_v6 }
  0x3e   :  { %3296 = vmatpush3.bf16.msra.mxu1 %v3849_v24 }
  0x3f   :  { %3297 = vmatprep.subr.bf16.mxu1 %v3676_v6 }
  0x42   :  { %3299 = vmatpush3.bf16.msra.mxu1 %v3861_v27 }
  0x43   :  { %3300 = vmatprep.subr.bf16.mxu1 %v3676_v6 }
  0x46   :  { %3302 = vmatpush3.bf16.msra.mxu1 %v3873_v30 }
  0x47   :  { %3303 = vmatprep.subr.bf16.mxu1 %v3676_v6 }
  0x4a   :  { %3305 = vmatpush3.bf16.msra.mxu1 %v3885_v33 }
  0x4b   :  { %3330 = vmatprep.subr.bf16.mxu1 %v3676_v6 }
  0xe0   :  { %v2691_v35 = vpop.f32.mrb[0].mxu1 }
  0xe1   :  { %v3917_v36 = vadd.f32 %v2691_v35, %v2397_v34  ;;  %v140_v37 = vpop.f32.mrb[1].mxu1 }
  0xe2   :  { %v3919_v38 = vadd.f32 %v2397_v34, %v140_v37  ;;  %v917_v37 = vld [vmem:[%s4355_s5 + $0x10] sm:$0xff] }
 0x100   :  { %v231_v39 = vpop.f32.mrb[2].mxu1 }
 0x101   :  { %v235_v40 = vadd.f32 %v231_v39, %v3919_v38  ;;  %v2726_v41 = vpop.f32.mrb[3].mxu1 }
 0x102   :  { %v824_v41 = vld [vmem:[%s4354_s4 + $0x8] sm:$0xff] }
 0x103   :  { %3588 = vtanh.f32 %v235_v40  ;;  %v823_v40 = vld [vmem:[%s4354_s4] sm:$0xff] }
 0x10d   :  { %v3589_v42 = vpop.eup %3588 }
 0x10e   :  { %238 = vrot.lane.b32.xlu0 %v3589_v42, %s3679_s20  ;;  %2760 = vmatmul.mubr.f32.vlgmr.msra.gmra.mrb[0].mxu0 %v3589_v42 }
 0x10f   :  { %3308 = vmatpush3.bf16.msra.mxu0 %v3798_v11  ;;  %2829 = vmatprep.mubr.msk.f32.mxu0 %vm3677_vm1, %v3678_v10 }
 0x110   :  { %3309 = vmatprep.subr.bf16.mxu0 %v3676_v6 }
 0x113   :  { %3311 = vmatpush3.bf16.msra.mxu0 %v3808_v14 }
 0x114   :  { %3312 = vmatprep.subr.bf16.mxu0 %v3676_v6 }
 0x117   :  { %3314 = vmatpush3.bf16.msra.mxu0 %v3823_v18 }
 0x118   :  { %3315 = vmatprep.subr.bf16.mxu0 %v3676_v6 }
 0x11b   :  { %3317 = vmatpush3.bf16.msra.mxu0 %v3837_v21 }
 0x11c   :  { %3318 = vmatprep.subr.bf16.mxu0 %v3676_v6 }
 0x11f   :  { %3320 = vmatpush3.bf16.msra.mxu0 %v3849_v24 }
 0x120   :  { %3321 = vmatprep.subr.bf16.mxu0 %v3676_v6 }
 0x123   :  { %3323 = vmatpush3.bf16.msra.mxu0 %v3861_v27 }
 0x124   :  { %3324 = vmatprep.subr.bf16.mxu0 %v3676_v6 }
 0x127   :  { %3326 = vmatpush3.bf16.msra.mxu0 %v3873_v30 }
 0x128   :  { %3327 = vmatprep.subr.bf16.mxu0 %v3676_v6 }
 0x12b   :  { %3329 = vmatpush3.bf16.msra.mxu0 %v3885_v33 }
 0x12c   :  { %3354 = vmatprep.subr.bf16.mxu0 %v3676_v6 }
 0x180   :  { %v239_v43 = vpop.permute.xlu0 %238 }
 0x181   :  { %v241_v44 = vsub.f32 %v3589_v42, %v239_v43  ;;  %v3426_v43 = vpack.c.bf16 %v824_v41, %v823_v40 }
 0x183   :  { %243 = vst.msk [vmem:[#allocation2] sm:$0x3] %vm242_vm2, %v241_v44  ;;  %v919_v44 = vld [vmem:[%s4355_s5 + $0x20] sm:$0xff] }
 0x1e1   :  { %v310_v45 = vpop.f32.mrb[0].mxu0 }
 0x1e2   :  { %v315_v46 = vrot.slane %v310_v45, 6  ;;  %v2761_v47 = vpop.f32.mrb[1].mxu0  ;;  %v920_v45 = vld [vmem:[%s4355_s5 + $0x28] sm:$0xff] }
 0x1e3   :  { %v826_v47 = vld [vmem:[%s4354_s4 + $0x18] sm:$0xff] }
 0x1e4   :  { %v317_v48 = vadd.f32 %v315_v46, %v3919_v38  ;;  %v825_v46 = vld [vmem:[%s4354_s4 + $0x10] sm:$0xff] }
 0x1e6   :  { %3590 = vtanh.f32 %v317_v48  ;;  %v921_v48 = vld [vmem:[%s4355_s5 + $0x30] sm:$0xff] }
 0x1f0   :  { %v3591_v49 = vpop.eup %3590 }
 0x1f1   :  { %320 = vrot.lane.b32.xlu0 %v3591_v49, %s3679_s20  ;;  %v326_v50 = vrot.slane %v3591_v49, 2 }
 0x1f3   :  { %2795 = vmatmul.mubr.f32.vlgmr.msra.gmra.mrb[4].mxu1 %v326_v50  ;;  %v3430_v50 = vpack.c.bf16 %v826_v47, %v825_v46  ;;  %v1571_v47 = vld [vmem:[%s4357_s7] sm:$0x3f] }
 0x1f4   :  { %3332 = vmatpush3.bf16.msra.mxu1 %v3798_v11  ;;  %2864 = vmatprep.mubr.msk.f32.mxu1 %vm3677_vm1, %v3678_v10 }
 0x1f5   :  { %3333 = vmatprep.subr.bf16.mxu1 %v3676_v6 }
 0x1f8   :  { %3335 = vmatpush3.bf16.msra.mxu1 %v3808_v14 }
 0x1f9   :  { %3336 = vmatprep.subr.bf16.mxu1 %v3676_v6 }
 0x1fc   :  { %3338 = vmatpush3.bf16.msra.mxu1 %v3823_v18 }
 0x1fd   :  { %3339 = vmatprep.subr.bf16.mxu1 %v3676_v6 }
 0x200   :  { %3341 = vmatpush3.bf16.msra.mxu1 %v3837_v21 }
 0x201   :  { %3342 = vmatprep.subr.bf16.mxu1 %v3676_v6 }
 0x204   :  { %3344 = vmatpush3.bf16.msra.mxu1 %v3849_v24 }
 0x205   :  { %3345 = vmatprep.subr.bf16.mxu1 %v3676_v6 }
 0x208   :  { %3347 = vmatpush3.bf16.msra.mxu1 %v3861_v27 }
 0x209   :  { %3348 = vmatprep.subr.bf16.mxu1 %v3676_v6 }
 0x20c   :  { %3350 = vmatpush3.bf16.msra.mxu1 %v3873_v30 }
 0x20d   :  { %3351 = vmatprep.subr.bf16.mxu1 %v3676_v6 }
 0x210   :  { %3353 = vmatpush3.bf16.msra.mxu1 %v3885_v33 }
 0x211   :  { %3378 = vmatprep.subr.bf16.mxu1 %v3676_v6 }
 0x263   :  { %v321_v51 = vpop.permute.xlu0 %320 }
 0x264   :  { %v323_v52 = vsub.f32 %v3591_v49, %v321_v51  ;;  %v922_v49 = vld [vmem:[%s4355_s5 + $0x38] sm:$0xff] }
 0x265   :  { %v4082_v51 = vpack.c.bf16 %v922_v49, %v921_v48  ;;  %v1573_v48 = vld [vmem:[%s4359_s9] sm:$0x3f] }
 0x266   :  { %325 = vst.msk [vmem:[#allocation2] sm:$0xc] %vm324_vm3, %v323_v52 }
 0x2c6   :  { %v394_v53 = vpop.f32.mrb[4].mxu1 }
 0x2c7   :  { %v399_v54 = vrot.slane %v394_v53, 4  ;;  %v2796_v55 = vpop.f32.mrb[5].mxu1 }
 0x2c9   :  { %v401_v56 = vadd.f32 %v399_v54, %v3919_v38 }
 0x2cb   :  { %3592 = vtanh.f32 %v401_v56 }
 0x2d5   :  { %v3593_v57 = vpop.eup %3592 }
 0x2d6   :  { %404 = vrot.lane.b32.xlu1 %v3593_v57, %s3679_s20  ;;  %v410_v58 = vrot.slane %v3593_v57, 4 }
 0x2d8   :  { %2830 = vmatmul.mubr.f32.vlgmr.msra.gmra.mrb[2].mxu0 %v410_v58  ;;  %v2400_v58 = vld [vmem:[%s4356_s6] ss:$0 sm:$0xff]  ;;  %s3685_s6 = smov 125  }
 0x2d9   :  { %3356 = vmatpush3.bf16.msra.mxu0 %v3798_v11  ;;  %2899 = vmatprep.mubr.msk.f32.mxu0 %vm3677_vm1, %v3678_v10 }
 0x2da   :  { %3357 = vmatprep.subr.bf16.mxu0 %v3676_v6 }
 0x2dd   :  { %3359 = vmatpush3.bf16.msra.mxu0 %v3808_v14 }
 0x2de   :  { %3360 = vmatprep.subr.bf16.mxu0 %v3676_v6 }
 0x2e1   :  { %3362 = vmatpush3.bf16.msra.mxu0 %v3823_v18 }
 0x2e2   :  { %3363 = vmatprep.subr.bf16.mxu0 %v3676_v6 }
 0x2e5   :  { %3365 = vmatpush3.bf16.msra.mxu0 %v3837_v21 }
 0x2e6   :  { %3366 = vmatprep.subr.bf16.mxu0 %v3676_v6 }
 0x2e9   :  { %3368 = vmatpush3.bf16.msra.mxu0 %v3849_v24 }
 0x2ea   :  { %3369 = vmatprep.subr.bf16.mxu0 %v3676_v6 }
 0x2ed   :  { %3371 = vmatpush3.bf16.msra.mxu0 %v3861_v27 }
 0x2ee   :  { %3372 = vmatprep.subr.bf16.mxu0 %v3676_v6 }
 0x2f1   :  { %3374 = vmatpush3.bf16.msra.mxu0 %v3873_v30 }
 0x2f2   :  { %3375 = vmatprep.subr.bf16.mxu0 %v3676_v6 }
 0x2f5   :  { %3377 = vmatpush3.bf16.msra.mxu0 %v3885_v33 }
 0x2f6   :  { %3402 = vmatprep.subr.bf16.mxu0 %v3676_v6 }
 0x348   :  { %v405_v59 = vpop.permute.xlu1 %404 }
 0x349   :  { %v407_v60 = vsub.f32 %v3593_v57, %v405_v59 }
 0x34b   :  { %409 = vst.msk [vmem:[#allocation2] sm:$0x30] %vm408_vm4, %v407_v60 }
 0x3ab   :  { %v478_v61 = vpop.f32.mrb[2].mxu0 }
 0x3ac   :  { %v483_v62 = vrot.slane %v478_v61, 2  ;;  %v2831_v63 = vpop.f32.mrb[3].mxu0 }
 0x3ae   :  { %v485_v0 = vadd.f32 %v483_v62, %v3919_v38  ;;  %v918_v38 = vld [vmem:[%s4355_s5 + $0x18] sm:$0xff] }
 0x3af   :  { %v4050_v39 = vpack.c.bf16 %v918_v38, %v917_v37 }
 0x3b0   :  { %3594 = vtanh.f32 %v485_v0 }
 0x3ba   :  { %v3595_v1 = vpop.eup %3594 }
 0x3bb   :  { %488 = vrot.lane.b32.xlu1 %v3595_v1, %s3679_s20  ;;  %v494_v2 = vrot.slane %v3595_v1, 6 }
 0x3bd   :  { %2865 = vmatmul.mubr.f32.vlgmr.msra.gmra.mrb[6].mxu1 %v494_v2 }
 0x3be   :  { %3380 = vmatpush3.bf16.msra.mxu1 %v3798_v11  ;;  %2934 = vmatprep.mubr.msk.f32.mxu1 %vm3677_vm1, %v3678_v10 }
 0x3bf   :  { %3381 = vmatprep.subr.bf16.mxu1 %v3676_v6 }
 0x3c2   :  { %3383 = vmatpush3.bf16.msra.mxu1 %v3808_v14 }
 0x3c3   :  { %3384 = vmatprep.subr.bf16.mxu1 %v3676_v6 }
 0x3c6   :  { %3386 = vmatpush3.bf16.msra.mxu1 %v3823_v18 }
 0x3c7   :  { %3387 = vmatprep.subr.bf16.mxu1 %v3676_v6 }
 0x3ca   :  { %3389 = vmatpush3.bf16.msra.mxu1 %v3837_v21 }
 0x3cb   :  { %3390 = vmatprep.subr.bf16.mxu1 %v3676_v6 }
 0x3ce   :  { %3392 = vmatpush3.bf16.msra.mxu1 %v3849_v24 }
 0x3cf   :  { %3393 = vmatprep.subr.bf16.mxu1 %v3676_v6 }
 0x3d2   :  { %3395 = vmatpush3.bf16.msra.mxu1 %v3861_v27 }
 0x3d3   :  { %3396 = vmatprep.subr.bf16.mxu1 %v3676_v6 }
 0x3d6   :  { %3398 = vmatpush3.bf16.msra.mxu1 %v3873_v30 }
 0x3d7   :  { %3399 = vmatprep.subr.bf16.mxu1 %v3676_v6 }
 0x3da   :  { %3401 = vmatpush3.bf16.msra.mxu1 %v3885_v33 }
 0x3db   :  { %3427 = vmatprep.subr.bf16.mxu1 %v3426_v43 }
 0x42d   :  { %v489_v3 = vpop.permute.xlu1 %488 }
 0x42e   :  { %v491_v4 = vsub.f32 %v3595_v1, %v489_v3 }
 0x430   :  { %493 = vst.msk [vmem:[#allocation2] sm:$0xc0] %vm492_vm5, %v491_v4 }
 0x437   :  { %v821_v19 = vld [vmem:[#allocation2] sm:$0xff] }
 0x490   :  { %v562_v5 = vpop.f32.mrb[6].mxu1 }
 0x491   :  { %v566_v7 = vadd.f32 %v562_v5, %v3917_v36  ;;  %v2866_v8 = vpop.f32.mrb[7].mxu1 }
 0x493   :  { %3596 = vtanh.f32 %v566_v7 }
 0x49d   :  { %v3597_v9 = vpop.eup %3596 }
 0x49e   :  { %569 = vrot.lane.b32.xlu0 %v3597_v9, %s3679_s20  ;;  %2900 = vmatmul.mubr.f32.vlgmr.msra.gmra.mrb[4].mxu0 %v3597_v9 }
 0x49f   :  { %3404 = vmatpush3.bf16.msra.mxu0 %v3798_v11  ;;  %2969 = vmatprep.mubr.msk.f32.mxu0 %vm3677_vm1, %v3678_v10 }
 0x4a0   :  { %3405 = vmatprep.subr.bf16.mxu0 %v3676_v6 }
 0x4a3   :  { %3407 = vmatpush3.bf16.msra.mxu0 %v3808_v14 }
 0x4a4   :  { %3408 = vmatprep.subr.bf16.mxu0 %v3676_v6 }
 0x4a7   :  { %3410 = vmatpush3.bf16.msra.mxu0 %v3823_v18 }
 0x4a8   :  { %3411 = vmatprep.subr.bf16.mxu0 %v3676_v6 }
 0x4ab   :  { %3413 = vmatpush3.bf16.msra.mxu0 %v3837_v21 }
 0x4ac   :  { %3414 = vmatprep.subr.bf16.mxu0 %v3676_v6 }
 0x4af   :  { %3416 = vmatpush3.bf16.msra.mxu0 %v3849_v24 }
 0x4b0   :  { %3417 = vmatprep.subr.bf16.mxu0 %v3676_v6 }
 0x4b3   :  { %3419 = vmatpush3.bf16.msra.mxu0 %v3861_v27 }
 0x4b4   :  { %3420 = vmatprep.subr.bf16.mxu0 %v3676_v6 }
 0x4b7   :  { %3422 = vmatpush3.bf16.msra.mxu0 %v3873_v30  ;;  %v4039_v30 = vpack.c.bf16 %v916_v29, %v915_v28 }
 0x4b8   :  { %3423 = vmatprep.subr.bf16.mxu0 %v3676_v6 }
 0x4bb   :  { %3425 = vmatpush3.bf16.msra.mxu0 %v3885_v33 }
 0x4bc   :  { %3434 = vmatprep.subr.bf16.mxu0 %v3676_v6 }
 0x510   :  { %v570_v11 = vpop.permute.xlu0 %569 }
 0x511   :  { %v572_v12 = vsub.f32 %v3597_v9, %v570_v11 }
 0x513   :  { %573 = vst.msk [vmem:[#allocation2 + $0x8] sm:$0x3] %vm242_vm2, %v572_v12 }
 0x571   :  { %v640_v13 = vpop.f32.mrb[4].mxu0 }
 0x572   :  { %v645_v14 = vrot.slane %v640_v13, 6  ;;  %v2901_v15 = vpop.f32.mrb[5].mxu0 }
 0x574   :  { %v647_v16 = vadd.f32 %v645_v14, %v3917_v36 }
 0x576   :  { %3598 = vtanh.f32 %v647_v16 }
 0x580   :  { %v3599_v17 = vpop.eup %3598 }
 0x581   :  { %650 = vrot.lane.b32.xlu1 %v3599_v17, %s3679_s20  ;;  %v655_v18 = vrot.slane %v3599_v17, 2 }
 0x583   :  { %2935 = vmatmul.mubr.f32.vlgmr.msra.gmra.mrb[8].mxu1 %v655_v18 }
 0x584   :  { %2980 = vmatprep.mubr.msk.f32.mxu1 %vm67_vm0, %v821_v19  ;;  %3429 = vmatpush3.bf16.msra.mxu1 %v3426_v43  ;;  %v1579_v43 = vld [vmem:[%s4362_s12] sm:$0xff] }
 0x585   :  { %3431 = vmatprep.subr.bf16.mxu1 %v3430_v50 }
 0x588   :  { %3433 = vmatpush3.bf16.msra.mxu1 %v3430_v50 }
 0x589   :  { %3446 = vmatprep.subr.bf16.mxu1 %v3676_v6 }
 0x5f3   :  { %v651_v20 = vpop.permute.xlu1 %650 }
 0x5f4   :  { %v653_v21 = vsub.f32 %v3599_v17, %v651_v20 }
 0x5f6   :  { %654 = vst.msk [vmem:[#allocation2 + $0x8] sm:$0xc] %vm324_vm3, %v653_v21 }
 0x656   :  { %v723_v22 = vpop.f32.mrb[8].mxu1 }
 0x657   :  { %v728_v23 = vrot.slane %v723_v22, 4  ;;  %v2936_v24 = vpop.f32.mrb[9].mxu1 }
 0x659   :  { %v730_v25 = vadd.f32 %v728_v23, %v3917_v36 }
 0x65b   :  { %3600 = vtanh.f32 %v730_v25 }
 0x665   :  { %v3601_v26 = vpop.eup %3600 }
 0x666   :  { %733 = vrot.lane.b32.xlu0 %v3601_v26, %s3679_s20  ;;  %v738_v27 = vrot.slane %v3601_v26, 4 }
 0x668   :  { %2970 = vmatmul.mubr.f32.vlgmr.msra.gmra.mrb[6].mxu0 %v738_v27 }
 0x669   :  { %2999 = vmatprep.mubr.msk.f32.mxu0 %vm3677_vm1, %v3678_v10  ;;  %3436 = vmatpush3.bf16.msra.mxu0 %v4039_v30 }
 0x66a   :  { %3437 = vmatprep.subr.bf16.mxu0 %v3676_v6 }
 0x66d   :  { %3439 = vmatpush3.bf16.msra.mxu0 %v4050_v39 }
 0x66e   :  { %3440 = vmatprep.subr.bf16.mxu0 %v3676_v6 }
 0x6d8   :  { %v734_v31 = vpop.permute.xlu0 %733 }
 0x6d9   :  { %v736_v32 = vsub.f32 %v3601_v26, %v734_v31 }
 0x6db   :  { %737 = vst.msk [vmem:[#allocation2 + $0x8] sm:$0x30] %vm408_vm4, %v736_v32 }
 0x73b   :  { %v806_v33 = vpop.f32.mrb[6].mxu0 }
 0x73c   :  { %v811_v34 = vrot.slane %v806_v33, 2  ;;  %v2971_v35 = vpop.f32.mrb[7].mxu0 }
 0x73e   :  { %v813_v42 = vadd.f32 %v811_v34, %v3917_v36  ;;  %v4070_v36 = vpack.c.bf16 %v920_v45, %v919_v44  ;;  %v1580_v44 = vld [vmem:[%s4362_s12 + $0x8] sm:$0xff] }
 0x740   :  { %3602 = vtanh.f32 %v813_v42  ;;  %3442 = vmatpush3.bf16.msra.mxu0 %v4070_v36 }
 0x741   :  { %3443 = vmatprep.subr.bf16.mxu0 %v3676_v6 }
 0x744   :  { %3445 = vmatpush3.bf16.msra.mxu0 %v4082_v51 }
 0x745   :  { %3458 = vmatprep.subr.bf16.mxu0 %v3676_v6 }
 0x747   :  { %3000 = vmatmul.mubr.f32.vlgmr.msra.gmra.mrb[8].mxu0 %v3678_v10 }
 0x748   :  { %3460 = vmatpush3.bf16.msra.mxu0 %v4039_v30  ;;  %3037 = vmatprep.mubr.msk.f32.mxu0 %vm3677_vm1, %v3678_v10 }
 0x749   :  { %3461 = vmatprep.subr.bf16.mxu0 %v3676_v6 }
 0x74a   :  { %v3603_v52 = vpop.eup %3602 }
 0x74b   :  { %816 = vrot.lane.b32.xlu1 %v3603_v52, %s3679_s20 }
 0x74c   :  { %3463 = vmatpush3.bf16.msra.mxu0 %v4050_v39 }
 0x74d   :  { %3464 = vmatprep.subr.bf16.mxu0 %v3676_v6 }
 0x750   :  { %3466 = vmatpush3.bf16.msra.mxu0 %v4070_v36 }
 0x751   :  { %3467 = vmatprep.subr.bf16.mxu0 %v3676_v6 }
 0x754   :  { %3469 = vmatpush3.bf16.msra.mxu0 %v4082_v51 }
 0x755   :  { %3482 = vmatprep.subr.bf16.mxu0 %v3676_v6 }
 0x7bd   :  { %v817_v53 = vpop.permute.xlu1 %816 }
 0x7be   :  { %v819_v54 = vsub.f32 %v3603_v52, %v817_v53  ;;  %v1582_v52 = vld [vmem:[%s4362_s12 + $0x18] sm:$0xff] }
 0x7c0   :  { %820 = vst.msk [vmem:[#allocation2 + $0x8] sm:$0xc0] %vm492_vm5, %v819_v54 }
 0x7c7   :  { %v822_v55 = vld [vmem:[#allocation2 + $0x8] sm:$0xff] }
 0x7c8   :  { %2981 = vmatmul.mubr.msk.f32.vlgmr.msra.gmra.mrb[10].mxu1 %vm67_vm0, %v822_v55 }
 0x7c9   :  { %3448 = vmatpush3.bf16.msra.mxu1 %v4039_v30  ;;  %3018 = vmatprep.mubr.msk.f32.mxu1 %vm3677_vm1, %v3678_v10 }
 0x7ca   :  { %3449 = vmatprep.subr.bf16.mxu1 %v3676_v6 }
 0x7cd   :  { %3451 = vmatpush3.bf16.msra.mxu1 %v4050_v39 }
 0x7ce   :  { %3452 = vmatprep.subr.bf16.mxu1 %v3676_v6 }
 0x7d1   :  { %3454 = vmatpush3.bf16.msra.mxu1 %v4070_v36 }
 0x7d2   :  { %3455 = vmatprep.subr.bf16.mxu1 %v3676_v6 }
 0x7d5   :  { %3457 = vmatpush3.bf16.msra.mxu1 %v4082_v51 }
 0x7d6   :  { %3470 = vmatprep.subr.bf16.mxu1 %v3676_v6 }
 0x81a   :  { %v993_v56 = vpop.f32.mrb[8].mxu0 }
 0x81b   :  { %v3001_v57 = vpop.f32.mrb[9].mxu0 }
 0x81c   :  { %v1575_v57 = vld [vmem:[%s4361_s11] sm:$0xff] }
 0x89b   :  { %v2982_v59 = vpop.f32.mrb[10].mxu1 }
 0x89c   :  { %v4115_v60 = vadd.f32 %v2982_v59, %v2400_v58  ;;  %v906_v61 = vpop.f32.mrb[11].mxu1  ;;  %v1574_v59 = vld [vmem:[%s4360_s10] sm:$0x3f] }
 0x89d   :  { %v4117_v62 = vadd.f32 %v2400_v58, %v906_v61  ;;  %v1576_v58 = vld [vmem:[%s4361_s11 + $0x8] sm:$0xff] }
 0x89f   :  { %v997_v63 = vadd.f32 %v993_v56, %v4117_v62 }
 0x8a1   :  { %3604 = vtanh.f32 %v997_v63  ;;  %v3537_v63 = vpack.c.bf16 %v1576_v58, %v1575_v57 }
 0x8ab   :  { %v3605_v0 = vpop.eup %3604 }
 0x8ac   :  { %1000 = vst.msk [vmem:[#allocation3] sm:$0x1] %vm999_vm6, %v3605_v0  ;;  %3019 = vmatmul.mubr.msk.f32.vlgmr.msra.gmra.mrb[12].mxu1 %vm923_vm8, %v3605_v0 }
 0x8ad   :  { %1002 = vst.msk [vmem:[#allocation3 + $0x7] sm:$0x2] %vm1001_vm7, %v3605_v0  ;;  %3472 = vmatpush3.bf16.msra.mxu1 %v4039_v30  ;;  %3056 = vmatprep.mubr.msk.f32.mxu1 %vm3677_vm1, %v3678_v10 }
 0x8ae   :  { %3473 = vmatprep.subr.bf16.mxu1 %v3676_v6 }
 0x8b1   :  { %3475 = vmatpush3.bf16.msra.mxu1 %v4050_v39 }
 0x8b2   :  { %3476 = vmatprep.subr.bf16.mxu1 %v3676_v6 }
 0x8b5   :  { %3478 = vmatpush3.bf16.msra.mxu1 %v4070_v36 }
 0x8b6   :  { %3479 = vmatprep.subr.bf16.mxu1 %v3676_v6 }
 0x8b9   :  { %3481 = vmatpush3.bf16.msra.mxu1 %v4082_v51 }
 0x8ba   :  { %3494 = vmatprep.subr.bf16.mxu1 %v3676_v6 }
 0x97f   :  { %v1072_v1 = vpop.f32.mrb[12].mxu1 }
 0x980   :  { %v1077_v2 = vrot.slane %v1072_v1, 6  ;;  %v3020_v3 = vpop.f32.mrb[13].mxu1 }
 0x981   :  { %v1577_v3 = vld [vmem:[%s4361_s11 + $0x10] sm:$0xff] }
 0x982   :  { %v1079_v4 = vadd.f32 %v1077_v2, %v4117_v62 }
 0x984   :  { %3606 = vtanh.f32 %v1079_v4  ;;  %v1578_v4 = vld [vmem:[%s4361_s11 + $0x18] sm:$0xff]  ;;  %s3684_s11 = smov 80  }
 0x98e   :  { %v3607_v5 = vpop.eup %3606 }
 0x98f   :  { %1082 = vst.msk [vmem:[#allocation3 - $0x1] sm:$0x4] %vm1081_vm9, %v3607_v5  ;;  %v1086_v7 = vrot.slane %v3607_v5, 2 }
 0x990   :  { %1084 = vst.msk [vmem:[#allocation3 + $0x6] sm:$0x8] %vm1083_vm10, %v3607_v5 }
 0x991   :  { %3038 = vmatmul.mubr.msk.f32.vlgmr.msra.gmra.mrb[10].mxu0 %vm923_vm8, %v1086_v7 }
 0x992   :  { %3484 = vmatpush3.bf16.msra.mxu0 %v4039_v30  ;;  %3075 = vmatprep.mubr.msk.f32.mxu0 %vm3677_vm1, %v3678_v10 }
 0x993   :  { %3485 = vmatprep.subr.bf16.mxu0 %v3676_v6 }
 0x996   :  { %3487 = vmatpush3.bf16.msra.mxu0 %v4050_v39 }
 0x997   :  { %3488 = vmatprep.subr.bf16.mxu0 %v3676_v6 }
 0x99a   :  { %3490 = vmatpush3.bf16.msra.mxu0 %v4070_v36 }
 0x99b   :  { %3491 = vmatprep.subr.bf16.mxu0 %v3676_v6 }
 0x99e   :  { %3493 = vmatpush3.bf16.msra.mxu0 %v4082_v51 }
 0x99f   :  { %3506 = vmatprep.subr.bf16.mxu0 %v3676_v6 }
 0xa64   :  { %v1155_v8 = vpop.f32.mrb[10].mxu0 }
 0xa65   :  { %v1160_v9 = vrot.slane %v1155_v8, 4  ;;  %v3039_v11 = vpop.f32.mrb[11].mxu0  ;;  %v3540_v8 = vpack.c.bf16 %v1578_v4, %v1577_v3 }
 0xa66   :  { %v1572_v11 = vld [vmem:[%s4358_s8] sm:$0x3f]  ;;  %s3683_s8 = smov 64  }
 0xa67   :  { %v1162_v12 = vadd.f32 %v1160_v9, %v4117_v62 }
 0xa69   :  { %3608 = vtanh.f32 %v1162_v12 }
 0xa73   :  { %v3609_v13 = vpop.eup %3608 }
 0xa74   :  { %1165 = vst.msk [vmem:[#allocation3 - $0x2] sm:$0x10] %vm1164_vm11, %v3609_v13  ;;  %v1169_v14 = vrot.slane %v3609_v13, 4 }
 0xa75   :  { %1167 = vst.msk [vmem:[#allocation3 + $0x5] sm:$0x20] %vm1166_vm12, %v3609_v13 }
 0xa76   :  { %3057 = vmatmul.mubr.msk.f32.vlgmr.msra.gmra.mrb[14].mxu1 %vm923_vm8, %v1169_v14 }
 0xa77   :  { %3496 = vmatpush3.bf16.msra.mxu1 %v4039_v30  ;;  %3094 = vmatprep.mubr.msk.f32.mxu1 %vm3677_vm1, %v3678_v10 }
 0xa78   :  { %3497 = vmatprep.subr.bf16.mxu1 %v3676_v6 }
 0xa7b   :  { %3499 = vmatpush3.bf16.msra.mxu1 %v4050_v39 }
 0xa7c   :  { %3500 = vmatprep.subr.bf16.mxu1 %v3676_v6 }
 0xa7f   :  { %3502 = vmatpush3.bf16.msra.mxu1 %v4070_v36 }
 0xa80   :  { %3503 = vmatprep.subr.bf16.mxu1 %v3676_v6 }
 0xa83   :  { %3505 = vmatpush3.bf16.msra.mxu1 %v4082_v51 }
 0xa84   :  { %3518 = vmatprep.subr.bf16.mxu1 %v3676_v6 }
 0xb49   :  { %v1238_v15 = vpop.f32.mrb[14].mxu1 }
 0xb4a   :  { %v1243_v16 = vrot.slane %v1238_v15, 2  ;;  %v3058_v17 = vpop.f32.mrb[15].mxu1 }
 0xb4c   :  { %v1245_v18 = vadd.f32 %v1243_v16, %v4117_v62 }
 0xb4e   :  { %3610 = vtanh.f32 %v1245_v18 }
 0xb58   :  { %v3611_v19 = vpop.eup %3610 }
 0xb59   :  { %v1252_v20 = vrot.slane %v3611_v19, 6  ;;  %1248 = vst.msk [vmem:[#allocation3 - $0x3] sm:$0x40] %vm1247_vm13, %v3611_v19 }
 0xb5a   :  { %1250 = vst.msk [vmem:[#allocation3 + $0x4] sm:$0x80] %vm1249_vm14, %v3611_v19 }
 0xb5b   :  { %3076 = vmatmul.mubr.msk.f32.vlgmr.msra.gmra.mrb[12].mxu0 %vm923_vm8, %v1252_v20  ;;  %v2239_v20 = vld [vmem:[%s4363_s13] sm:$0xff] }
 0xb5c   :  { %3508 = vmatpush3.bf16.msra.mxu0 %v4039_v30  ;;  %3113 = vmatprep.mubr.msk.f32.mxu0 %vm3677_vm1, %v3678_v10 }
 0xb5d   :  { %3509 = vmatprep.subr.bf16.mxu0 %v3676_v6 }
 0xb60   :  { %3511 = vmatpush3.bf16.msra.mxu0 %v4050_v39 }
 0xb61   :  { %3512 = vmatprep.subr.bf16.mxu0 %v3676_v6 }
 0xb64   :  { %3514 = vmatpush3.bf16.msra.mxu0 %v4070_v36 }
 0xb65   :  { %3515 = vmatprep.subr.bf16.mxu0 %v3676_v6 }
 0xb68   :  { %3517 = vmatpush3.bf16.msra.mxu0 %v4082_v51 }
 0xb69   :  { %3135 = vmatprep.subr.mxu0 %v3678_v10 }
 0xc2e   :  { %v1321_v21 = vpop.f32.mrb[12].mxu0 }
 0xc2f   :  { %v1325_v22 = vadd.f32 %v1321_v21, %v4115_v60  ;;  %v3077_v23 = vpop.f32.mrb[13].mxu0  ;;  %v2240_v21 = vld [vmem:[%s4363_s13 + $0x8] sm:$0xff] }
 0xc30   :  { %v2242_v23 = vld [vmem:[%s4363_s13 + $0x18] sm:$0xff] }
 0xc31   :  { %3612 = vtanh.f32 %v1325_v22  ;;  %v3555_v22 = vpack.c.bf16 %v2240_v21, %v2239_v20 }
 0xc3b   :  { %v3613_v24 = vpop.eup %3612 }
 0xc3c   :  { %1327 = vst.msk [vmem:[#allocation3 + $0x4] sm:$0x1] %vm999_vm6, %v3613_v24  ;;  %3095 = vmatmul.mubr.msk.f32.vlgmr.msra.gmra.mrb[16].mxu1 %vm923_vm8, %v3613_v24  ;;  %vm1889_vm6 = vcmask 122880  }
 0xc3d   :  { %1328 = vst.msk [vmem:[#allocation3 + $0xb] sm:$0x2] %vm1001_vm7, %v3613_v24  ;;  %3520 = vmatpush3.bf16.msra.mxu1 %v4039_v30  ;;  %3132 = vmatprep.mubr.msk.f32.mxu1 %vm3677_vm1, %v3678_v10  ;;  %vm1905_vm7 = vcmask 519555  }
 0xc3e   :  { %3521 = vmatprep.subr.bf16.mxu1 %v3676_v6 }
 0xc41   :  { %3523 = vmatpush3.bf16.msra.mxu1 %v4050_v39 }
 0xc42   :  { %3524 = vmatprep.subr.bf16.mxu1 %v3676_v6 }
 0xc45   :  { %3526 = vmatpush3.bf16.msra.mxu1 %v4070_v36  ;;  %v3531_v36 = vpack.c.bf16 %v1580_v44, %v1579_v43 }
 0xc46   :  { %3527 = vmatprep.subr.bf16.mxu1 %v3676_v6 }
 0xc49   :  { %3529 = vmatpush3.bf16.msra.mxu1 %v4082_v51  ;;  %v1581_v51 = vld [vmem:[%s4362_s12 + $0x10] sm:$0xff] }
 0xc4a   :  { %3140 = vmatprep.subr.mxu1 %v3678_v10  ;;  %v3534_v53 = vpack.c.bf16 %v1582_v52, %v1581_v51  ;;  %v2418_v51 = vld [vmem:[%s4364_s14] ss:$0 sm:$0xff]  ;;  %s3686_s14 = smov [#allocation5]  }
 0xc4b   :  { %s2375_s26 = sshll.u32 %s3686_s14, 4  ;;  %s2376_s26 = int_to_ptr.vmem [resolvable:$true] %s2375_s26 }
 0xc4c   :  { %s3628_s27 = scalar_lea.vmem %s2376_s26, 32  ;;  %p3633_p1 = scmp.lt.s32.totalorder %s2376_s26, %s2376_s26 }
 0xc4d   :  { %p3629_p0 = scmp.ne.s32.totalorder %s2376_s26, %s3628_s27  ;;  %p3634_p2 = scmp.lt.s32.totalorder %s3628_s27, %s3628_s27 }
 0xc4f   :  { %p3635_p3 = por %p3634_p2, %p3633_p1 }
 0xc51   :  { %p3636_p4 = pnand %p3635_p3, %p3629_p0 }
 0xd0f   :  { %v1398_v25 = vpop.f32.mrb[16].mxu1 }
 0xd10   :  { %v1403_v26 = vrot.slane %v1398_v25, 6  ;;  %v3096_v27 = vpop.f32.mrb[17].mxu1 }
 0xd11   :  { %v2243_v27 = vld [vmem:[%s4363_s13 + $0x20] sm:$0xff] }
 0xd12   :  { %v1405_v28 = vadd.f32 %v1403_v26, %v4115_v60 }
 0xd14   :  { %3614 = vtanh.f32 %v1405_v28  ;;  %v2244_v28 = vld [vmem:[%s4363_s13 + $0x28] sm:$0xff] }
 0xd1e   :  { %v3615_v29 = vpop.eup %3614 }
 0xd1f   :  { %1407 = vst.msk [vmem:[#allocation3 + $0x3] sm:$0x4] %vm1081_vm9, %v3615_v29  ;;  %v1410_v30 = vrot.slane %v3615_v29, 2  ;;  %vm1915_vm9 = vcmask 784005  }
 0xd20   :  { %1408 = vst.msk [vmem:[#allocation3 + $0xa] sm:$0x8] %vm1083_vm10, %v3615_v29  ;;  %v3561_v29 = vpack.c.bf16 %v2244_v28, %v2243_v27  ;;  %vm2258_vm10 = vcmask 785408  }
 0xd21   :  { %3114 = vmatmul.mubr.msk.f32.vlgmr.msra.gmra.mrb[14].mxu0 %vm923_vm8, %v1410_v30  ;;  %v2245_v30 = vld [vmem:[%s4363_s13 + $0x30] sm:$0xff] }
 0xd22   :  { %3137 = vmatprep.mubr.msk.f32.mxu0 %vm3677_vm1, %v3678_v10 }
 0xdf4   :  { %v1479_v31 = vpop.f32.mrb[14].mxu0 }
 0xdf5   :  { %v1484_v32 = vrot.slane %v1479_v31, 4  ;;  %v3115_v33 = vpop.f32.mrb[15].mxu0  ;;  %v2246_v31 = vld [vmem:[%s4363_s13 + $0x38] sm:$0xff] }
 0xdf6   :  { %v3564_v33 = vpack.c.bf16 %v2246_v31, %v2245_v30 }
 0xdf7   :  { %v1486_v34 = vadd.f32 %v1484_v32, %v4115_v60 }
 0xdf9   :  { %3616 = vtanh.f32 %v1486_v34 }
 0xe03   :  { %v3617_v35 = vpop.eup %3616 }
 0xe04   :  { %1488 = vst.msk [vmem:[#allocation3 + $0x2] sm:$0x10] %vm1164_vm11, %v3617_v35  ;;  %v1491_v37 = vrot.slane %v3617_v35, 4  ;;  %vm2346_vm11 = vcmask 33816  }
 0xe05   :  { %1489 = vst.msk [vmem:[#allocation3 + $0x9] sm:$0x20] %vm1166_vm12, %v3617_v35  ;;  %v2247_v35 = vld [vmem:[%s4363_s13 + $0x40] sm:$0xff]  ;;  %vm2332_vm12 = vcmask 17408  }
 0xe06   :  { %3133 = vmatmul.mubr.msk.f32.vlgmr.msra.gmra.mrb[18].mxu1 %vm923_vm8, %v1491_v37  ;;  %v2248_v37 = vld [vmem:[%s4363_s13 + $0x48] sm:$0xff]  ;;  %vm1910_vm8 = vcmask 651780  }
 0xe07   :  { %3142 = vmatprep.mubr.msk.f32.mxu1 %vm3677_vm1, %v3678_v10 }
 0xed9   :  { %v1560_v38 = vpop.f32.mrb[18].mxu1 }
 0xeda   :  { %v1565_v39 = vrot.slane %v1560_v38, 2  ;;  %v3134_v40 = vpop.f32.mrb[19].mxu1  ;;  %v3567_v38 = vpack.c.bf16 %v2248_v37, %v2247_v35 }
 0xedb   :  { %v2250_v40 = vld [vmem:[%s4363_s13 + $0x58] sm:$0xff] }
 0xedc   :  { %v1567_v41 = vadd.f32 %v1565_v39, %v4115_v60  ;;  %v2249_v39 = vld [vmem:[%s4363_s13 + $0x50] sm:$0xff] }
 0xede   :  { %3618 = vtanh.f32 %v1567_v41  ;;  %v3570_v41 = vpack.c.bf16 %v2250_v40, %v2249_v39 }
 0xee8   :  { %v3619_v42 = vpop.eup %3618 }
 0xee9   :  { %1569 = vst.msk [vmem:[#allocation3 + $0x1] sm:$0x40] %vm1247_vm13, %v3619_v42  ;;  %vm2357_vm13 = vcmask 9216  }
 0xeea   :  { %1570 = vst.msk [vmem:[#allocation3 + $0x8] sm:$0x80] %vm1249_vm14, %v3619_v42 }
 0xef0   :  { %v1583_v46 = vld [vmem:[#allocation3] sm:$0xff] }
 0xef1   :  { %v1917_v45 = vld [vmem:[#allocation3 + $0x8] sm:$0xff]  ;;  %1659 = vrot.lane.b32.xlu0 %v1583_v46, %s3679_s20  ;;  %3136 = vmatpush3.msra.mxu0 %v1583_v46 }
 0xef2   :  { %1989 = vrot.lane.b32.xlu1 %v1917_v45, %s3679_s20  ;;  %3138 = vmatmul.mubr.msk.f32.vlgmr.msra.gmra.mrb[16].mxu0 %vm1584_vm15, %v1571_v47  ;;  %s3681_s20 = smov 32  }
 0xef3   :  { %3530 = vmatprep.subr.bf16.mxu0 %v3676_v6  ;;  %3153 = vmatprep.mubr.msk.f32.mxu0 %vm3677_vm1, %v3678_v10 }
 0xef4   :  { %3532 = vmatpush3.bf16.msra.mxu0 %v3531_v36 }
 0xef5   :  { %3533 = vmatprep.subr.bf16.mxu0 %v3676_v6 }
 0xef8   :  { %3535 = vmatpush3.bf16.msra.mxu0 %v3534_v53 }
 0xef9   :  { %3536 = vmatprep.subr.bf16.mxu0 %v3676_v6 }
 0xf63   :  { %v1660_v49 = vpop.permute.xlu0 %1659 }
 0xf64   :  { %3141 = vmatpush3.msra.mxu1 %v1660_v49  ;;  %v1990_v50 = vpop.permute.xlu1 %1989 }
 0xf65   :  { %3143 = vmatmul.mubr.msk.f32.vlgmr.msra.gmra.mrb[20].mxu1 %vm1584_vm15, %v1573_v48  ;;  %3167 = vmatprep.subr.mxu1 %v3678_v10 }
 0xf66   :  { %3168 = vmatpush3.msra.mxu1 %v1917_v45  ;;  %3169 = vmatprep.mubr.msk.f32.mxu1 %vm3677_vm1, %v3678_v10 }
 0xf67   :  { %3172 = vmatprep.subr.mxu1 %v3678_v10 }
 0xf69   :  { %3170 = vmatmul.mubr.msk.f32.vlgmr.msra.gmra.mrb[22].mxu1 %vm1584_vm15, %v1571_v47 }
 0xf6a   :  { %3173 = vmatpush3.msra.mxu1 %v1990_v50  ;;  %3174 = vmatprep.mubr.msk.f32.mxu1 %vm3677_vm1, %v3678_v10 }
 0xf6b   :  { %3542 = vmatprep.subr.bf16.mxu1 %v3676_v6 }
 0xf6d   :  { %3175 = vmatmul.mubr.msk.f32.vlgmr.msra.gmra.mrb[24].mxu1 %vm1584_vm15, %v1573_v48 }
 0xf6e   :  { %3544 = vmatpush3.bf16.msra.mxu1 %v3531_v36  ;;  %3185 = vmatprep.mubr.msk.f32.mxu1 %vm3677_vm1, %v3678_v10 }
 0xf6f   :  { %3545 = vmatprep.subr.bf16.mxu1 %v3676_v6 }
 0xf72   :  { %3547 = vmatpush3.bf16.msra.mxu1 %v3534_v53 }
 0xf73   :  { %3548 = vmatprep.subr.bf16.mxu1 %v3676_v6 }
 0xfc5   :  { %v1654_v54 = vpop.f32.mrb[16].mxu0 }
 0xfc6   :  { %v3139_v55 = vpop.f32.mrb[17].mxu0  ;;  %v1736_v0 = vmul.f32 0.01, %v1654_v54  ;;  %vm1735_vm3 = vcmp.gt.f32.partialorder %v1654_v54, 0.0 }
 0xfc8   :  { %v1737_v7 = vsel %vm1735_vm3, %v1654_v54, %v1736_v0 }
 0xfc9   :  { %v1738_v14 = vadd.f32 %v1737_v7, %v1572_v11 }
0x1038   :  { %v1731_v56 = vpop.f32.mrb[20].mxu1 }
0x1039   :  { %vm1739_vm2 = vcmp.gt.f32.partialorder %v1731_v56, 0.0  ;;  %v1740_v60 = vmul.f32 0.01, %v1731_v56  ;;  %v3144_v61 = vpop.f32.mrb[21].mxu1 }
0x103b   :  { %v1741_v62 = vsel %vm1739_vm2, %v1731_v56, %v1740_v60 }
0x103c   :  { %v1742_v1 = vadd.f32 %v1741_v62, %v1574_v59  ;;  %v1984_v2 = vpop.f32.mrb[22].mxu1 }
0x103d   :  { %v3171_v5 = vpop.f32.mrb[23].mxu1  ;;  %v2063_v17 = vmul.f32 0.01, %v1984_v2  ;;  %vm2062_vm5 = vcmp.gt.f32.partialorder %v1984_v2, 0.0 }
0x103e   :  { %3154 = vmatmul.mubr.msk.f32.vlgmr.msra.gmra.mrb[18].mxu0 %vm67_vm0, %v1742_v1 }
0x103f   :  { %3538 = vmatpush3.bf16.msra.mxu0 %v3537_v63  ;;  %3164 = vmatprep.mubr.msk.f32.mxu0 %vm3677_vm1, %v3678_v10  ;;  %v2064_v18 = vsel %vm2062_vm5, %v1984_v2, %v2063_v17 }
0x1040   :  { %v2058_v9 = vpop.f32.mrb[24].mxu1  ;;  %3539 = vmatprep.subr.bf16.mxu0 %v3676_v6  ;;  %v2065_v19 = vadd.f32 %v2064_v18, %v1572_v11 }
0x1041   :  { %vm2066_vm4 = vcmp.gt.f32.partialorder %v2058_v9, 0.0  ;;  %v2067_v12 = vmul.f32 0.01, %v2058_v9  ;;  %v3176_v13 = vpop.f32.mrb[25].mxu1 }
0x1043   :  { %v2068_v15 = vsel %vm2066_vm4, %v2058_v9, %v2067_v12  ;;  %3541 = vmatpush3.bf16.msra.mxu0 %v3540_v8 }
0x1044   :  { %v2069_v16 = vadd.f32 %v2068_v15, %v1574_v59  ;;  %3554 = vmatprep.subr.bf16.mxu0 %v3676_v6 }
0x1046   :  { %3165 = vmatmul.mubr.msk.f32.vlgmr.msra.gmra.mrb[18].mxu0 %vm67_vm0, %v1738_v14  ;;  %3186 = vmatmul.mubr.msk.f32.vlgmr.msra.gmra.mrb[26].mxu1 %vm67_vm0, %v2069_v16 }
0x1047   :  { %3550 = vmatpush3.bf16.msra.mxu1 %v3537_v63  ;;  %3196 = vmatprep.mubr.msk.f32.mxu1 %vm3677_vm1, %v3678_v10 }
0x1048   :  { %3551 = vmatprep.subr.bf16.mxu1 %v3676_v6  ;;  %3223 = vmatprep.mubr.msk.f32.mxu0 %vm3677_vm1, %v3678_v10  ;;  %v2241_v10 = vld [vmem:[%s4363_s13 + $0x10] sm:$0xff]  ;;  %vm1900_vm1 = vcmask 387330  }
0x1049   :  { %3556 = vmatpush3.bf16.msra.mxu0 %v3555_v22  ;;  %v3558_v25 = vpack.c.bf16 %v2242_v23, %v2241_v10 }
0x104a   :  { %3557 = vmatprep.subr.bf16.mxu0 %v3676_v6 }
0x104b   :  { %3553 = vmatpush3.bf16.msra.mxu1 %v3540_v8 }
0x104d   :  { %3559 = vmatpush3.bf16.msra.mxu0 %v3558_v25 }
0x104e   :  { %3197 = vmatmul.mubr.msk.f32.vlgmr.msra.gmra.mrb[26].mxu1 %vm67_vm0, %v2065_v19  ;;  %3560 = vmatprep.subr.bf16.mxu0 %v3676_v6  ;;  %vm1895_vm0 = vcmask 255105  }
0x1051   :  { %3562 = vmatpush3.bf16.msra.mxu0 %v3561_v29 }
0x1052   :  { %3563 = vmatprep.subr.bf16.mxu0 %v3676_v6 }
0x1055   :  { %3565 = vmatpush3.bf16.msra.mxu0 %v3564_v33 }
0x1056   :  { %3566 = vmatprep.subr.bf16.mxu0 %v3676_v6 }
0x1059   :  { %3568 = vmatpush3.bf16.msra.mxu0 %v3567_v38 }
0x105a   :  { %3569 = vmatprep.subr.bf16.mxu0 %v3676_v6 }
0x105d   :  { %3571 = vmatpush3.bf16.msra.mxu0 %v3570_v41 }
0x1119   :  { %v1885_v24 = vpop.f32.mrb[18].mxu0 }
0x111a   :  { %1892 = vrot.lane.b32.xlu0 %v1885_v24, %s3680_s30  ;;  %v3166_v26 = vpop.f32.mrb[19].mxu0  ;;  %1890 = vst.msk [vmem:[#allocation4] sm:$0x1] %vm1889_vm6, %v1885_v24 }
0x111e   :  { %1897 = vrot.lane.b32.xlu0 %v1885_v24, %s3681_s20 }
0x1121   :  { %v2212_v32 = vpop.f32.mrb[26].mxu1 }
0x1122   :  { %2218 = vrot.lane.b32.xlu1 %v2212_v32, %s3680_s30  ;;  %v3198_v34 = vpop.f32.mrb[27].mxu1  ;;  %1902 = vrot.lane.b32.xlu0 %v1885_v24, %s3682_s1  ;;  %2216 = vst.msk [vmem:[#allocation4 + $0x1] sm:$0x1] %vm1889_vm6, %v2212_v32 }
0x1126   :  { %2222 = vrot.lane.b32.xlu1 %v2212_v32, %s3681_s20  ;;  %1907 = vrot.lane.b32.xlu0 %v1885_v24, %s3683_s8 }
0x112a   :  { %2226 = vrot.lane.b32.xlu1 %v2212_v32, %s3682_s1  ;;  %1912 = vrot.lane.b32.xlu0 %v1885_v24, %s3684_s11 }
0x112e   :  { %2230 = vrot.lane.b32.xlu1 %v2212_v32, %s3683_s8 }
0x1132   :  { %2234 = vrot.lane.b32.xlu1 %v2212_v32, %s3684_s11 }
0x118c   :  { %v1893_v42 = vpop.permute.xlu0 %1892 }
0x118d   :  { %1896 = vst.msk [vmem:[#allocation4 - $0x1] sm:$0x2] %vm1895_vm0, %v1893_v42 }
0x1190   :  { %v1898_v43 = vpop.permute.xlu0 %1897 }
0x1191   :  { %1901 = vst.msk [vmem:[#allocation4 - $0x2] sm:$0x4] %vm1900_vm1, %v1898_v43 }
0x1194   :  { %v2219_v44 = vpop.permute.xlu1 %2218  ;;  %v1903_v45 = vpop.permute.xlu0 %1902 }
0x1195   :  { %2221 = vst.msk [vmem:[#allocation4] sm:$0x2] %vm1895_vm0, %v2219_v44 }
0x1196   :  { %1906 = vst.msk [vmem:[#allocation4 - $0x3] sm:$0x8] %vm1905_vm7, %v1903_v45 }
0x1198   :  { %v2223_v46 = vpop.permute.xlu1 %2222  ;;  %v1908_v6 = vpop.permute.xlu0 %1907 }
0x1199   :  { %2225 = vst.msk [vmem:[#allocation4 - $0x1] sm:$0x4] %vm1900_vm1, %v2223_v46 }
0x119a   :  { %1911 = vst.msk [vmem:[#allocation4 - $0x4] sm:$0x10] %vm1910_vm8, %v1908_v6 }
0x119c   :  { %v2227_v36 = vpop.permute.xlu1 %2226  ;;  %v1913_v47 = vpop.permute.xlu0 %1912 }
0x119d   :  { %2229 = vst.msk [vmem:[#allocation4 - $0x2] sm:$0x8] %vm1905_vm7, %v2227_v36 }
0x119e   :  { %1916 = vst.msk [vmem:[#allocation4 - $0x5] sm:$0x20] %vm1915_vm9, %v1913_v47 }
0x11a0   :  { %v2231_v48 = vpop.permute.xlu1 %2230 }
0x11a1   :  { %2233 = vst.msk [vmem:[#allocation4 - $0x3] sm:$0x10] %vm1910_vm8, %v2231_v48 }
0x11a4   :  { %v2235_v49 = vpop.permute.xlu1 %2234 }
0x11a5   :  { %2237 = vst.msk [vmem:[#allocation4 - $0x4] sm:$0x20] %vm1915_vm9, %v2235_v49 }
0x11ac   :  { %v2238_v50 = vld [vmem:[#allocation4] sm:$0x3] }
0x11ad   :  { %3224 = vmatmul.mubr.msk.f32.vlgmr.msra.gmra.mrb[20].mxu0 %vm2258_vm10, %v2238_v50 }
0x1280   :  { %v2328_v52 = vpop.f32.mrb[20].mxu0 }
0x1281   :  { %v2329_v53 = vadd.f32 %v2418_v51, %v2328_v52  ;;  %v3225_v54 = vpop.f32.mrb[21].mxu0 }
0x1283   :  { %v2347_v55 = vsel %vm2346_vm11, %v2329_v53, -inf  ;;  %v2333_v60 = vsel %vm2332_vm12, %v2329_v53, -inf }
0x1284   :  { %2348 = vmax.xlane.f32.xlu0 %v2347_v55 }
0x1311   :  { %v2349_v56 = vpop.xlane.xlu0 %2348 }
0x1312   :  { %v2350_v57 = vsub.f32 %v2329_v53, %v2349_v56 }
0x1314   :  { %v2351_v58 = vmul.f32 1.442695, %v2350_v57 }
0x1316   :  { %3620 = vpow2.f32 %v2351_v58 }
0x1320   :  { %v3621_v59 = vpop.eup %3620 }
0x1321   :  { %2354 = vrot.lane.b32.xlu1 %v3621_v59, %s3685_s6 }
0x1345   :  { %2334 = vmax.xlane.f32.xlu1 %v2333_v60 }
0x1393   :  { %v2355_v61 = vpop.permute.xlu1 %2354 }
0x1394   :  { %v2358_v62 = vsel %vm2357_vm13, %v2355_v61, 0.0 }
0x1395   :  { %2359 = vadd.xlane.f32.xlu0 %v2358_v62 }
0x13d2   :  { %v2335_v63 = vpop.xlane.xlu1 %2334 }
0x13d3   :  { %v2336_v0 = vsub.f32 %v2329_v53, %v2335_v63 }
0x13d5   :  { %v2337_v1 = vmul.f32 1.442695, %v2336_v0 }
0x13d7   :  { %3622 = vpow2.f32 %v2337_v1 }
0x13e1   :  { %v3623_v2 = vpop.eup %3622 }
0x13e2   :  { %v2339_v3 = vsel %vm2332_vm12, %v3623_v2, 0.0 }
0x13e3   :  { %2340 = vadd.xlane.f32.xlu0 %v2339_v3 }
0x1422   :  { %v2360_v4 = vpop.xlane.xlu0 %2359 }
0x1423   :  { %3624 = vlog2.f32 %v2360_v4 }
0x142d   :  { %v3625_v5 = vpop.eup %3624 }
0x142e   :  { %v2362_v7 = vmul.f32 0.6931472, %v3625_v5 }
0x1430   :  { %v2363_v8 = vsub.f32 %v2350_v57, %v2362_v7 }
0x1432   :  { %2365 = vrot.lane.b32.xlu0 %v2363_v8, %s3685_s6 }
0x1470   :  { %v2341_v9 = vpop.xlane.xlu0 %2340 }
0x1471   :  { %3626 = vlog2.f32 %v2341_v9 }
0x147b   :  { %v3627_v11 = vpop.eup %3626 }
0x147c   :  { %v2343_v12 = vmul.f32 0.6931472, %v3627_v11 }
0x147e   :  { %v2344_v13 = vsub.f32 %v2336_v0, %v2343_v12 }
0x1480   :  { %2345 = vst.msk [vmem:[#allocation5] sm:$0x3] %vm2332_vm12, %v2344_v13 }
0x1481   :  { %3639 = shalt.err (!%p3636_p4)
}
0x1482   :  { %s3640_s30 = scalar_lea.hbm %s4365_s15, 32 }
0x1483   :  { %p3641_p5 = scmp.ne.s32.totalorder %s4365_s15, %s3640_s30  ;;  %p3644_p6 = scmp.lt.u32.totalorder %s3640_s30, %s4365_s15 }
0x1485   :  { %p3646_p7 = pnand %p3644_p6, %p3641_p5 }
0x1487   :  { %3649 = shalt.err (!%p3646_p7)
}
0x1488   :  { %2378 = dma.vmem_to_hbm [thread:$0]  %s2376_s26, 32, %s4365_s15, [#allocation6]  }
0x1489   :  { %s3687_s2 = smov [#allocation7]  }
0x148a   :  { %s2385_s19 = sshll.u32 %s3687_s2, 4  ;;  %s2386_s19 = int_to_ptr.vmem [resolvable:$true] %s2385_s19 }
0x148b   :  { %s3650_s3 = scalar_lea.vmem %s2386_s19, 32  ;;  %p3655_p9 = scmp.lt.s32.totalorder %s2386_s19, %s2386_s19 }
0x148c   :  { %p3651_p8 = scmp.ne.s32.totalorder %s2386_s19, %s3650_s3  ;;  %p3656_p10 = scmp.lt.s32.totalorder %s3650_s3, %s3650_s3 }
0x148e   :  { %p3657_p11 = por %p3656_p10, %p3655_p9 }
0x1490   :  { %p3658_p12 = pnand %p3657_p11, %p3651_p8 }
0x14a4   :  { %v2366_v14 = vpop.permute.xlu0 %2365 }
0x14a5   :  { %2368 = vst.msk [vmem:[#allocation7] sm:$0x3] %vm2357_vm13, %v2366_v14 }
0x14a6   :  { %3661 = shalt.err (!%p3658_p12)
}
0x14a7   :  { %s3662_s12 = scalar_lea.hbm %s4366_s16, 32 }
0x14a8   :  { %p3663_p13 = scmp.ne.s32.totalorder %s4366_s16, %s3662_s12  ;;  %p3666_p0 = scmp.lt.u32.totalorder %s3662_s12, %s4366_s16 }
0x14aa   :  { %p3668_p1 = pnand %p3666_p0, %p3663_p13 }
0x14ac   :  { %3671 = shalt.err (!%p3668_p1)
}
0x14ad   :  { %2388 = dma.vmem_to_hbm [thread:$0]  %s2386_s19, 32, %s4366_s16, [#allocation8]  }
0x14ae   :  { %3672 = dma.done.wait [#allocation6], 32  }
0x14af   :  { %3673 = vsyncadd [#allocation6], 4294967264 }
0x14b0   :  { %3674 = dma.done.wait [#allocation8], 32  }
0x14b1   :  { %3675 = vsyncadd [#allocation8], 4294967264 }
0x14b2   :  { %2395 = vsyncpa [#allocation6], 1 }
0x14b3   :  { %2396 = vsyncpa [#allocation8], 1 }

</bundles_post_ra>
